<compile_context>
chip_gen: v5e
topology: v5e:2x2
jax: 0.10.0
libtpu: 0.0.40
codegen_flags: <defaults>
</compile_context>

<pallas_src>
import functools

import jax
import jax.numpy as jnp
from jax.experimental import pallas as pl
from jax.experimental.pallas import tpu as pltpu

EPS = 1e-6  # LayerNormalization eps in the reference PyTorch code


def _layernorm(x, alpha, bias):
    # PyTorch tutorial LayerNormalization: alpha*(x-mean)/(std+eps)+bias with
    # torch.Tensor.std's default Bessel correction (unbiased, ddof=1).
    d = x.shape[-1]
    mean = jnp.mean(x, axis=-1, keepdims=True)
    centered = x - mean
    var = jnp.sum(centered * centered, axis=-1, keepdims=True) * (1.0 / (d - 1))
    inv = pl.reciprocal(jnp.sqrt(var) + EPS, approx=True)  # EUP, frees VALU
    return alpha * centered * inv + bias


def encoder_block_kernel(x_ref, mask_ref,
                         wq_ref, wk_ref, wv_ref, wo_ref,
                         ln1_a_ref, ln1_b_ref,
                         w1_ref, b1_ref, w2_ref, b2_ref,
                         ln2_a_ref, ln2_b_ref,
                         out_ref,
                         xn1_scr, k_scr, v_scr, bias_scr,
                         *, num_heads, q_tile):
    qi = pl.program_id(1)
    S, D = x_ref.shape
    dk = D // num_heads

    # --- per-batch-element setup: cache LN(x), K, V (bf16) and mask bias -----
    @pl.when(qi == 0)
    def _():
        xk = x_ref[...].astype(jnp.float32)                          # (S, D)
        xkn = _layernorm(xk, ln1_a_ref[...], ln1_b_ref[...]).astype(jnp.bfloat16)
        xn1_scr[...] = xkn
        k_scr[...] = jnp.dot(xkn, wk_ref[...],
                             preferred_element_type=jnp.float32).astype(jnp.bfloat16)
        v_scr[...] = jnp.dot(xkn, wv_ref[...],
                             preferred_element_type=jnp.float32).astype(jnp.bfloat16)
        bias_scr[...] = jnp.where(mask_ref[...] == 0, -1e9, 0.0).astype(jnp.float32)

    # --- query slab for this grid step ---------------------------------------
    start = pl.multiple_of(qi * q_tile, q_tile)
    xq = x_ref[pl.ds(start, q_tile), :].astype(jnp.float32)          # raw residual input
    xqn = xn1_scr[pl.ds(start, q_tile), :]                           # cached LN(x), bf16

    # residual connection 0: pre-norm self-attention
    # 1/sqrt(dk) was folded into wq on the host.
    q = jnp.dot(xqn, wq_ref[...],
                preferred_element_type=jnp.float32).astype(jnp.bfloat16)  # (tS, D)

    k = k_scr[...]                                                   # (S, D) bf16
    v = v_scr[...]
    bias = bias_scr[...]                                             # (1, S) f32, hoisted

    attn = jnp.zeros((q_tile, D), jnp.float32)
    for h in range(num_heads):                                       # static head loop
        sl = slice(h * dk, (h + 1) * dk)
        qh = q[:, sl]
        kh = k[:, sl]
        vh = v[:, sl]
        scores = jax.lax.dot_general(qh, kh, (((1,), (1,)), ((), ())),
                                     preferred_element_type=jnp.float32)  # (tS, S)
        scores = scores + bias                                       # masked_fill(-1e9)
        scores = scores - jnp.max(scores, axis=-1, keepdims=True)
        e = jnp.exp(scores)
        p = e * pl.reciprocal(jnp.sum(e, axis=-1, keepdims=True), approx=True)
        head_out = jnp.dot(p.astype(jnp.bfloat16), vh,
                           preferred_element_type=jnp.float32)       # (tS, dk)
        # Accumulate through W_O slice: no concatenate over heads.
        attn = attn + jnp.dot(head_out.astype(jnp.bfloat16), wo_ref[sl, :],
                              preferred_element_type=jnp.float32)
    # TODO(synk): dropout is treated as identity (inference / eval mode).
    x1 = xq + attn

    # residual connection 1: pre-norm feed-forward
    xn2 = _layernorm(x1, ln2_a_ref[...], ln2_b_ref[...]).astype(jnp.bfloat16)
    hdn = jnp.maximum(
        jnp.dot(xn2, w1_ref[...], preferred_element_type=jnp.float32) + b1_ref[...],
        0.0)
    ff = jnp.dot(hdn.astype(jnp.bfloat16), w2_ref[...],
                 preferred_element_type=jnp.float32) + b2_ref[...]
    out_ref[...] = (x1 + ff).astype(out_ref.dtype)


def encoder_block(x, mask, params, num_heads, q_tile=None):
    B, S, D = x.shape
    d_ff = params["w1"].shape[1]
    dk = D // num_heads
    scale = 1.0 / float(dk) ** 0.5

    if q_tile is None:
        q_tile = S if S <= 256 else 256
    assert S % q_tile == 0 and (q_tile == S or q_tile % 8 == 0)
    n_q = S // q_tile

    bf16 = jnp.bfloat16
    # Matmul weights as bf16 (half the HBM->VMEM traffic); per-channel vectors
    # (LayerNorm alpha/bias, FFN biases) stay f32 and are applied post-accum.
    # Attention scale folded into W_Q here (free: happens once on host).
    wq = (params["wq"] * scale).astype(bf16)
    wk = params["wk"].astype(bf16)
    wv = params["wv"].astype(bf16)
    wo = params["wo"].astype(bf16)
    w1 = params["w1"].astype(bf16)
    w2 = params["w2"].astype(bf16)

    def full(shape):
        return pl.BlockSpec(shape, lambda b, qb: (0,) * len(shape))

    kernel = functools.partial(encoder_block_kernel,
                               num_heads=num_heads, q_tile=q_tile)
    return pl.pallas_call(
        kernel,
        out_shape=jax.ShapeDtypeStruct((B, S, D), x.dtype),
        grid_spec=pltpu.PrefetchScalarGridSpec(
            num_scalar_prefetch=0,
            grid=(B, n_q),
            in_specs=[
                pl.BlockSpec((pl.Squeezed(), S, D), lambda b, qb: (b, 0, 0)),  # x
                pl.BlockSpec((pl.Squeezed(), 1, S), lambda b, qb: (b, 0, 0)),  # mask
                full((D, D)), full((D, D)), full((D, D)), full((D, D)),  # wq,wk,wv,wo
                full((1, D)), full((1, D)),                              # ln1 a, b
                full((D, d_ff)), full((1, d_ff)),                        # w1, b1
                full((d_ff, D)), full((1, D)),                           # w2, b2
                full((1, D)), full((1, D)),                              # ln2 a, b
            ],
            out_specs=pl.BlockSpec((pl.Squeezed(), q_tile, D),
                                   lambda b, qb: (b, qb, 0)),
            scratch_shapes=[
                pltpu.VMEM((S, D), bf16),         # cached LayerNorm1(x)
                pltpu.VMEM((S, D), bf16),         # cached K
                pltpu.VMEM((S, D), bf16),         # cached V
                pltpu.VMEM((1, S), jnp.float32),  # additive mask bias
            ],
        ),
        compiler_params=pltpu.CompilerParams(
            dimension_semantics=("parallel", "arbitrary"),
            vmem_limit_bytes=64 * 1024 * 1024),
    )(x, mask, wq, wk, wv, wo,
      params["ln1_a"], params["ln1_b"],
      w1, params["b1"], w2, params["b2"],
      params["ln2_a"], params["ln2_b"])


def encoder_block_ref(x, mask, params, num_heads):
    """Pure-JAX f32 reference mirroring the PyTorch forward (dropout = identity)."""
    B, S, D = x.shape
    dk = D // num_heads

    def ln(y, a, b):
        mean = jnp.mean(y, axis=-1, keepdims=True)
        std = jnp.std(y, axis=-1, keepdims=True, ddof=1)
        return a * (y - mean) / (std + EPS) + b

    xn = ln(x, params["ln1_a"][0], params["ln1_b"][0])
    q = xn @ params["wq"]
    k = xn @ params["wk"]
    v = xn @ params["wv"]
    q = q.reshape(B, S, num_heads, dk).transpose(0, 2, 1, 3)
    k = k.reshape(B, S, num_heads, dk).transpose(0, 2, 1, 3)
    v = v.reshape(B, S, num_heads, dk).transpose(0, 2, 1, 3)
    scores = (q @ k.transpose(0, 1, 3, 2)) / jnp.sqrt(jnp.float32(dk))
    scores = jnp.where(mask[:, None, :, :] == 0, -1e9, scores)
    p = jax.nn.softmax(scores, axis=-1)
    o = (p @ v).transpose(0, 2, 1, 3).reshape(B, S, D)
    x1 = x + o @ params["wo"]

    xn2 = ln(x1, params["ln2_a"][0], params["ln2_b"][0])
    ff = jnp.maximum(xn2 @ params["w1"] + params["b1"][0], 0.0) @ params["w2"] \
         + params["b2"][0]
    return x1 + ff


if __name__ == "__main__":
    # Small shapes; S=16 with q_tile=8 exercises the 2-tile query pipeline.
    B, S, D, H, DFF, QT = 2, 16, 32, 4, 64, 8

    key = jax.random.PRNGKey(0)
    keys = jax.random.split(key, 9)
    params = {
        # nn.Linear weights stored pre-transposed to (in, out) for y = x @ W.
        "wq": 0.1 * jax.random.normal(keys[0], (D, D), jnp.float32),
        "wk": 0.1 * jax.random.normal(keys[1], (D, D), jnp.float32),
        "wv": 0.1 * jax.random.normal(keys[2], (D, D), jnp.float32),
        "wo": 0.1 * jax.random.normal(keys[3], (D, D), jnp.float32),
        "ln1_a": jnp.ones((1, D), jnp.float32),
        "ln1_b": jnp.zeros((1, D), jnp.float32),
        "w1": 0.1 * jax.random.normal(keys[4], (D, DFF), jnp.float32),
        "b1": 0.1 * jax.random.normal(keys[5], (1, DFF), jnp.float32),
        "w2": 0.1 * jax.random.normal(keys[6], (DFF, D), jnp.float32),
        "b2": 0.1 * jax.random.normal(keys[7], (1, D), jnp.float32),
        "ln2_a": jnp.ones((1, D), jnp.float32),
        "ln2_b": jnp.zeros((1, D), jnp.float32),
    }

    x = jax.random.normal(keys[8], (B, S, D), jnp.float32)
    # src_mask: (B, 1, S); batch 1 has its last 5 key positions masked out.
    mask = jnp.ones((B, 1, S), jnp.int32).at[1, :, 11:].set(0)

    out = encoder_block(x, mask, params, H, q_tile=QT)
    jax.block_until_ready(out)

    ref = encoder_block_ref(x, mask, params, H)
    assert out.shape == (B, S, D)
    # bf16 matmul operands + approx reciprocals -> compare at bf16-class tolerance.
    assert jnp.allclose(out, ref, atol=5e-2, rtol=5e-2), (
        "mismatch vs reference: max abs err = %g"
        % float(jnp.max(jnp.abs(out - ref))))
    print("KERNEL_OK")
</pallas_src>

<mosaic_0001>
module attributes {stable_mosaic.version = 11 : i64} {
  func.func @encoder_block_kernel(%arg0: i32, %arg1: i32, %arg2: memref<1x16x32xf32, #tpu.memory_space<vmem>>, %arg3: memref<1x1x16xi32, #tpu.memory_space<vmem>>, %arg4: memref<32x32xbf16, #tpu.memory_space<vmem>>, %arg5: memref<32x32xbf16, #tpu.memory_space<vmem>>, %arg6: memref<32x32xbf16, #tpu.memory_space<vmem>>, %arg7: memref<32x32xbf16, #tpu.memory_space<vmem>>, %arg8: memref<1x32xf32, #tpu.memory_space<vmem>>, %arg9: memref<1x32xf32, #tpu.memory_space<vmem>>, %arg10: memref<32x64xbf16, #tpu.memory_space<vmem>>, %arg11: memref<1x64xf32, #tpu.memory_space<vmem>>, %arg12: memref<64x32xbf16, #tpu.memory_space<vmem>>, %arg13: memref<1x32xf32, #tpu.memory_space<vmem>>, %arg14: memref<1x32xf32, #tpu.memory_space<vmem>>, %arg15: memref<1x32xf32, #tpu.memory_space<vmem>>, %arg16: memref<1x8x32xf32, #tpu.memory_space<vmem>>, %arg17: memref<16x32xbf16, #tpu.memory_space<vmem>>, %arg18: memref<16x32xbf16, #tpu.memory_space<vmem>>, %arg19: memref<16x32xbf16, #tpu.memory_space<vmem>>, %arg20: memref<1x16xf32, #tpu.memory_space<vmem>>) attributes {dimension_semantics = [#tpu.dimension_semantics<parallel>, #tpu.dimension_semantics<arbitrary>], iteration_bounds = array<i64: 2, 2>, scalar_prefetch = 0 : i64, scratch_operands = 4 : i64, tpu.core_type = #tpu.core_type<tc>, window_params = [{transform_indices = @transform_0, window_bounds = array<i64: 1, 16, 32>}, {transform_indices = @transform_1, window_bounds = array<i64: 1, 1, 16>}, {pipeline_mode = #tpu.pipeline_mode<synchronous>, transform_indices = @transform_2, window_bounds = array<i64: 32, 32>}, {pipeline_mode = #tpu.pipeline_mode<synchronous>, transform_indices = @transform_3, window_bounds = array<i64: 32, 32>}, {pipeline_mode = #tpu.pipeline_mode<synchronous>, transform_indices = @transform_4, window_bounds = array<i64: 32, 32>}, {pipeline_mode = #tpu.pipeline_mode<synchronous>, transform_indices = @transform_5, window_bounds = array<i64: 32, 32>}, {pipeline_mode = #tpu.pipeline_mode<synchronous>, transform_indices = @transform_6, window_bounds = array<i64: 1, 32>}, {pipeline_mode = #tpu.pipeline_mode<synchronous>, transform_indices = @transform_7, window_bounds = array<i64: 1, 32>}, {pipeline_mode = #tpu.pipeline_mode<synchronous>, transform_indices = @transform_8, window_bounds = array<i64: 32, 64>}, {pipeline_mode = #tpu.pipeline_mode<synchronous>, transform_indices = @transform_9, window_bounds = array<i64: 1, 64>}, {pipeline_mode = #tpu.pipeline_mode<synchronous>, transform_indices = @transform_10, window_bounds = array<i64: 64, 32>}, {pipeline_mode = #tpu.pipeline_mode<synchronous>, transform_indices = @transform_11, window_bounds = array<i64: 1, 32>}, {pipeline_mode = #tpu.pipeline_mode<synchronous>, transform_indices = @transform_12, window_bounds = array<i64: 1, 32>}, {pipeline_mode = #tpu.pipeline_mode<synchronous>, transform_indices = @transform_13, window_bounds = array<i64: 1, 32>}, {transform_indices = @transform_14, window_bounds = array<i64: 1, 8, 32>}]} {
    %c0_i32 = arith.constant 0 : i32
    %0 = arith.cmpi eq, %arg1, %c0_i32 : i32
    %1 = arith.extui %0 : i1 to i32
    %c0_i32_0 = arith.constant 0 : i32
    %2 = arith.cmpi ne, %1, %c0_i32_0 : i32
    scf.if %2 {
      %c0_60 = arith.constant 0 : index
      %c0_61 = arith.constant 0 : index
      %c0_62 = arith.constant 0 : index
      %147 = vector.load %arg2[%c0_60, %c0_61, %c0_62] : memref<1x16x32xf32, #tpu.memory_space<vmem>>, vector<1x16x32xf32>
      %148 = vector.shape_cast %147 : vector<1x16x32xf32> to vector<16x32xf32>
      %c0_63 = arith.constant 0 : index
      %c0_64 = arith.constant 0 : index
      %149 = vector.load %arg8[%c0_63, %c0_64] : memref<1x32xf32, #tpu.memory_space<vmem>>, vector<1x32xf32>
      %c0_65 = arith.constant 0 : index
      %c0_66 = arith.constant 0 : index
      %150 = vector.load %arg9[%c0_65, %c0_66] : memref<1x32xf32, #tpu.memory_space<vmem>>, vector<1x32xf32>
      %cst_67 = arith.constant dense<0.000000e+00> : vector<16xf32>
      %151 = vector.multi_reduction <add>, %148, %cst_67 [1] : vector<16x32xf32> to vector<16xf32>
      %152 = vector.shape_cast %151 : vector<16xf32> to vector<16x1xf32>
      %cst_68 = arith.constant 3.200000e+01 : f32
      %153 = vector.broadcast %cst_68 : f32 to vector<16x1xf32>
      %154 = arith.divf %152, %153 : vector<16x1xf32>
      %155 = vector.broadcast %154 : vector<16x1xf32> to vector<16x32xf32>
      %156 = arith.subf %148, %155 : vector<16x32xf32>
      %157 = arith.mulf %156, %156 : vector<16x32xf32>
      %cst_69 = arith.constant dense<0.000000e+00> : vector<16xf32>
      %158 = vector.multi_reduction <add>, %157, %cst_69 [1] : vector<16x32xf32> to vector<16xf32>
      %159 = vector.shape_cast %158 : vector<16xf32> to vector<16x1xf32>
      %cst_70 = arith.constant 0.0322580636 : f32
      %160 = vector.broadcast %cst_70 : f32 to vector<16x1xf32>
      %161 = arith.mulf %159, %160 : vector<16x1xf32>
      %162 = math.sqrt %161 : vector<16x1xf32>
      %cst_71 = arith.constant 9.99999997E-7 : f32
      %163 = vector.broadcast %cst_71 : f32 to vector<16x1xf32>
      %164 = arith.addf %162, %163 : vector<16x1xf32>
      %165 = tpu.reciprocal %164 {approx = true} : vector<16x1xf32> -> vector<16x1xf32>
      %166 = vector.broadcast %149 : vector<1x32xf32> to vector<16x32xf32>
      %167 = arith.mulf %166, %156 : vector<16x32xf32>
      %168 = vector.broadcast %165 : vector<16x1xf32> to vector<16x32xf32>
      %169 = arith.mulf %167, %168 : vector<16x32xf32>
      %170 = vector.broadcast %150 : vector<1x32xf32> to vector<16x32xf32>
      %171 = arith.addf %169, %170 : vector<16x32xf32>
      %172 = arith.truncf %171 : vector<16x32xf32> to vector<16x32xbf16>
      %c0_72 = arith.constant 0 : index
      %c0_73 = arith.constant 0 : index
      %173 = vector.load %arg17[%c0_72, %c0_73] : memref<16x32xbf16, #tpu.memory_space<vmem>>, vector<16x32xbf16>
      tpu.vector_store %arg17[%c0_72, %c0_73], %172 {strides = array<i32>} : memref<16x32xbf16, #tpu.memory_space<vmem>>, vector<16x32xbf16>,
      %c0_74 = arith.constant 0 : index
      %c0_75 = arith.constant 0 : index
      %174 = vector.load %arg5[%c0_74, %c0_75] : memref<32x32xbf16, #tpu.memory_space<vmem>>, vector<32x32xbf16>
      %cst_76 = arith.constant dense<0.000000e+00> : vector<16x32xf32>
      %175 = tpu.matmul %172, %174, %cst_76 {dimension_numbers = #tpu.dot_dimension_numbers<[1], [0], [0], [1], [0, 0, 1, 1], [], []>} : vector<16x32xbf16>, vector<32x32xbf16>, vector<16x32xf32> -> vector<16x32xf32>
      %176 = arith.truncf %175 : vector<16x32xf32> to vector<16x32xbf16>
      %c0_77 = arith.constant 0 : index
      %c0_78 = arith.constant 0 : index
      %177 = vector.load %arg18[%c0_77, %c0_78] : memref<16x32xbf16, #tpu.memory_space<vmem>>, vector<16x32xbf16>
      tpu.vector_store %arg18[%c0_77, %c0_78], %176 {strides = array<i32>} : memref<16x32xbf16, #tpu.memory_space<vmem>>, vector<16x32xbf16>,
      %c0_79 = arith.constant 0 : index
      %c0_80 = arith.constant 0 : index
      %178 = vector.load %arg6[%c0_79, %c0_80] : memref<32x32xbf16, #tpu.memory_space<vmem>>, vector<32x32xbf16>
      %cst_81 = arith.constant dense<0.000000e+00> : vector<16x32xf32>
      %179 = tpu.matmul %172, %178, %cst_81 {dimension_numbers = #tpu.dot_dimension_numbers<[1], [0], [0], [1], [0, 0, 1, 1], [], []>} : vector<16x32xbf16>, vector<32x32xbf16>, vector<16x32xf32> -> vector<16x32xf32>
      %180 = arith.truncf %179 : vector<16x32xf32> to vector<16x32xbf16>
      %c0_82 = arith.constant 0 : index
      %c0_83 = arith.constant 0 : index
      %181 = vector.load %arg19[%c0_82, %c0_83] : memref<16x32xbf16, #tpu.memory_space<vmem>>, vector<16x32xbf16>
      tpu.vector_store %arg19[%c0_82, %c0_83], %180 {strides = array<i32>} : memref<16x32xbf16, #tpu.memory_space<vmem>>, vector<16x32xbf16>,
      %c0_84 = arith.constant 0 : index
      %c0_85 = arith.constant 0 : index
      %c0_86 = arith.constant 0 : index
      %182 = vector.load %arg3[%c0_84, %c0_85, %c0_86] : memref<1x1x16xi32, #tpu.memory_space<vmem>>, vector<1x1x16xi32>
      %183 = vector.shape_cast %182 : vector<1x1x16xi32> to vector<1x16xi32>
      %c0_i32_87 = arith.constant 0 : i32
      %184 = vector.broadcast %c0_i32_87 : i32 to vector<1x16xi32>
      %185 = arith.cmpi eq, %183, %184 : vector<1x16xi32>
      %cst_88 = arith.constant -1.000000e+09 : f32
      %cst_89 = arith.constant 0.000000e+00 : f32
      %186 = vector.broadcast %cst_88 : f32 to vector<1x16xf32>
      %187 = vector.broadcast %cst_89 : f32 to vector<1x16xf32>
      %188 = arith.select %185, %186, %187 : vector<1x16xi1>, vector<1x16xf32>
      %c0_90 = arith.constant 0 : index
      %c0_91 = arith.constant 0 : index
      %189 = vector.load %arg20[%c0_90, %c0_91] : memref<1x16xf32, #tpu.memory_space<vmem>>, vector<1x16xf32>
      tpu.vector_store %arg20[%c0_90, %c0_91], %188 {strides = array<i32>} : memref<1x16xf32, #tpu.memory_space<vmem>>, vector<1x16xf32>,
    } else {
    }
    %c8_i32 = arith.constant 8 : i32
    %3 = arith.muli %arg1, %c8_i32 : i32
    %4 = tpu.assume_multiple %3, 8 : i32
    %c0 = arith.constant 0 : index
    %5 = arith.index_cast %4 : i32 to index
    %c0_1 = arith.constant 0 : index
    %6 = vector.load %arg2[%c0, %5, %c0_1] : memref<1x16x32xf32, #tpu.memory_space<vmem>>, vector<1x8x32xf32>
    %7 = vector.shape_cast %6 : vector<1x8x32xf32> to vector<8x32xf32>
    %8 = arith.index_cast %4 : i32 to index
    %c0_2 = arith.constant 0 : index
    %9 = vector.load %arg17[%8, %c0_2] : memref<16x32xbf16, #tpu.memory_space<vmem>>, vector<8x32xbf16>
    %c0_3 = arith.constant 0 : index
    %c0_4 = arith.constant 0 : index
    %10 = vector.load %arg4[%c0_3, %c0_4] : memref<32x32xbf16, #tpu.memory_space<vmem>>, vector<32x32xbf16>
    %cst = arith.constant dense<0.000000e+00> : vector<8x32xf32>
    %11 = tpu.matmul %9, %10, %cst {dimension_numbers = #tpu.dot_dimension_numbers<[1], [0], [0], [1], [0, 0, 1, 1], [], []>} : vector<8x32xbf16>, vector<32x32xbf16>, vector<8x32xf32> -> vector<8x32xf32>
    %12 = arith.truncf %11 : vector<8x32xf32> to vector<8x32xbf16>
    %c0_5 = arith.constant 0 : index
    %c0_6 = arith.constant 0 : index
    %13 = vector.load %arg18[%c0_5, %c0_6] : memref<16x32xbf16, #tpu.memory_space<vmem>>, vector<16x32xbf16>
    %c0_7 = arith.constant 0 : index
    %c0_8 = arith.constant 0 : index
    %14 = vector.load %arg19[%c0_7, %c0_8] : memref<16x32xbf16, #tpu.memory_space<vmem>>, vector<16x32xbf16>
    %c0_9 = arith.constant 0 : index
    %c0_10 = arith.constant 0 : index
    %15 = vector.load %arg20[%c0_9, %c0_10] : memref<1x16xf32, #tpu.memory_space<vmem>>, vector<1x16xf32>
    %cst_11 = arith.constant 0.000000e+00 : f32
    %16 = vector.broadcast %cst_11 : f32 to vector<8x32xf32>
    %17 = vector.extract_strided_slice %12 {offsets = [0, 0], sizes = [8, 8], strides = [1, 1]} : vector<8x32xbf16> to vector<8x8xbf16>
    %18 = vector.extract_strided_slice %13 {offsets = [0, 0], sizes = [16, 8], strides = [1, 1]} : vector<16x32xbf16> to vector<16x8xbf16>
    %19 = vector.extract_strided_slice %14 {offsets = [0, 0], sizes = [16, 8], strides = [1, 1]} : vector<16x32xbf16> to vector<16x8xbf16>
    %cst_12 = arith.constant dense<0.000000e+00> : vector<8x16xf32>
    %20 = tpu.matmul %17, %18, %cst_12 {dimension_numbers = #tpu.dot_dimension_numbers<[1], [1], [0], [0], [0, 0, 1, 0], [], []>} : vector<8x8xbf16>, vector<16x8xbf16>, vector<8x16xf32> -> vector<8x16xf32>
    %21 = vector.broadcast %15 : vector<1x16xf32> to vector<8x16xf32>
    %22 = arith.addf %20, %21 : vector<8x16xf32>
    %cst_13 = arith.constant dense<0xFF800000> : vector<8xf32>
    %23 = vector.multi_reduction <maximumf>, %22, %cst_13 [1] : vector<8x16xf32> to vector<8xf32>
    %24 = vector.shape_cast %23 : vector<8xf32> to vector<8x1xf32>
    %25 = vector.broadcast %24 : vector<8x1xf32> to vector<8x16xf32>
    %26 = arith.subf %22, %25 : vector<8x16xf32>
    %27 = math.exp %26 : vector<8x16xf32>
    %cst_14 = arith.constant dense<0.000000e+00> : vector<8xf32>
    %28 = vector.multi_reduction <add>, %27, %cst_14 [1] : vector<8x16xf32> to vector<8xf32>
    %29 = vector.shape_cast %28 : vector<8xf32> to vector<8x1xf32>
    %30 = tpu.reciprocal %29 {approx = true} : vector<8x1xf32> -> vector<8x1xf32>
    %31 = vector.broadcast %30 : vector<8x1xf32> to vector<8x16xf32>
    %32 = arith.mulf %27, %31 : vector<8x16xf32>
    %33 = arith.truncf %32 : vector<8x16xf32> to vector<8x16xbf16>
    %cst_15 = arith.constant dense<0.000000e+00> : vector<8x8xf32>
    %34 = tpu.matmul %33, %19, %cst_15 {dimension_numbers = #tpu.dot_dimension_numbers<[1], [0], [0], [1], [0, 0, 1, 1], [], []>} : vector<8x16xbf16>, vector<16x8xbf16>, vector<8x8xf32> -> vector<8x8xf32>
    %35 = arith.truncf %34 : vector<8x8xf32> to vector<8x8xbf16>
    %c0_16 = arith.constant 0 : index
    %c0_17 = arith.constant 0 : index
    %36 = vector.load %arg7[%c0_16, %c0_17] : memref<32x32xbf16, #tpu.memory_space<vmem>>, vector<8x32xbf16>
    %cst_18 = arith.constant dense<0.000000e+00> : vector<8x32xf32>
    %37 = tpu.matmul %35, %36, %cst_18 {dimension_numbers = #tpu.dot_dimension_numbers<[1], [0], [0], [1], [0, 0, 1, 1], [], []>} : vector<8x8xbf16>, vector<8x32xbf16>, vector<8x32xf32> -> vector<8x32xf32>
    %38 = arith.addf %16, %37 : vector<8x32xf32>
    %39 = vector.extract_strided_slice %12 {offsets = [0, 8], sizes = [8, 8], strides = [1, 1]} : vector<8x32xbf16> to vector<8x8xbf16>
    %40 = vector.extract_strided_slice %13 {offsets = [0, 8], sizes = [16, 8], strides = [1, 1]} : vector<16x32xbf16> to vector<16x8xbf16>
    %41 = vector.extract_strided_slice %14 {offsets = [0, 8], sizes = [16, 8], strides = [1, 1]} : vector<16x32xbf16> to vector<16x8xbf16>
    %cst_19 = arith.constant dense<0.000000e+00> : vector<8x16xf32>
    %42 = tpu.matmul %39, %40, %cst_19 {dimension_numbers = #tpu.dot_dimension_numbers<[1], [1], [0], [0], [0, 0, 1, 0], [], []>} : vector<8x8xbf16>, vector<16x8xbf16>, vector<8x16xf32> -> vector<8x16xf32>
    %43 = vector.broadcast %15 : vector<1x16xf32> to vector<8x16xf32>
    %44 = arith.addf %42, %43 : vector<8x16xf32>
    %cst_20 = arith.constant dense<0xFF800000> : vector<8xf32>
    %45 = vector.multi_reduction <maximumf>, %44, %cst_20 [1] : vector<8x16xf32> to vector<8xf32>
    %46 = vector.shape_cast %45 : vector<8xf32> to vector<8x1xf32>
    %47 = vector.broadcast %46 : vector<8x1xf32> to vector<8x16xf32>
    %48 = arith.subf %44, %47 : vector<8x16xf32>
    %49 = math.exp %48 : vector<8x16xf32>
    %cst_21 = arith.constant dense<0.000000e+00> : vector<8xf32>
    %50 = vector.multi_reduction <add>, %49, %cst_21 [1] : vector<8x16xf32> to vector<8xf32>
    %51 = vector.shape_cast %50 : vector<8xf32> to vector<8x1xf32>
    %52 = tpu.reciprocal %51 {approx = true} : vector<8x1xf32> -> vector<8x1xf32>
    %53 = vector.broadcast %52 : vector<8x1xf32> to vector<8x16xf32>
    %54 = arith.mulf %49, %53 : vector<8x16xf32>
    %55 = arith.truncf %54 : vector<8x16xf32> to vector<8x16xbf16>
    %cst_22 = arith.constant dense<0.000000e+00> : vector<8x8xf32>
    %56 = tpu.matmul %55, %41, %cst_22 {dimension_numbers = #tpu.dot_dimension_numbers<[1], [0], [0], [1], [0, 0, 1, 1], [], []>} : vector<8x16xbf16>, vector<16x8xbf16>, vector<8x8xf32> -> vector<8x8xf32>
    %57 = arith.truncf %56 : vector<8x8xf32> to vector<8x8xbf16>
    %c8 = arith.constant 8 : index
    %c0_23 = arith.constant 0 : index
    %58 = vector.load %arg7[%c8, %c0_23] : memref<32x32xbf16, #tpu.memory_space<vmem>>, vector<8x32xbf16>
    %cst_24 = arith.constant dense<0.000000e+00> : vector<8x32xf32>
    %59 = tpu.matmul %57, %58, %cst_24 {dimension_numbers = #tpu.dot_dimension_numbers<[1], [0], [0], [1], [0, 0, 1, 1], [], []>} : vector<8x8xbf16>, vector<8x32xbf16>, vector<8x32xf32> -> vector<8x32xf32>
    %60 = arith.addf %38, %59 : vector<8x32xf32>
    %61 = vector.extract_strided_slice %12 {offsets = [0, 16], sizes = [8, 8], strides = [1, 1]} : vector<8x32xbf16> to vector<8x8xbf16>
    %62 = vector.extract_strided_slice %13 {offsets = [0, 16], sizes = [16, 8], strides = [1, 1]} : vector<16x32xbf16> to vector<16x8xbf16>
    %63 = vector.extract_strided_slice %14 {offsets = [0, 16], sizes = [16, 8], strides = [1, 1]} : vector<16x32xbf16> to vector<16x8xbf16>
    %cst_25 = arith.constant dense<0.000000e+00> : vector<8x16xf32>
    %64 = tpu.matmul %61, %62, %cst_25 {dimension_numbers = #tpu.dot_dimension_numbers<[1], [1], [0], [0], [0, 0, 1, 0], [], []>} : vector<8x8xbf16>, vector<16x8xbf16>, vector<8x16xf32> -> vector<8x16xf32>
    %65 = vector.broadcast %15 : vector<1x16xf32> to vector<8x16xf32>
    %66 = arith.addf %64, %65 : vector<8x16xf32>
    %cst_26 = arith.constant dense<0xFF800000> : vector<8xf32>
    %67 = vector.multi_reduction <maximumf>, %66, %cst_26 [1] : vector<8x16xf32> to vector<8xf32>
    %68 = vector.shape_cast %67 : vector<8xf32> to vector<8x1xf32>
    %69 = vector.broadcast %68 : vector<8x1xf32> to vector<8x16xf32>
    %70 = arith.subf %66, %69 : vector<8x16xf32>
    %71 = math.exp %70 : vector<8x16xf32>
    %cst_27 = arith.constant dense<0.000000e+00> : vector<8xf32>
    %72 = vector.multi_reduction <add>, %71, %cst_27 [1] : vector<8x16xf32> to vector<8xf32>
    %73 = vector.shape_cast %72 : vector<8xf32> to vector<8x1xf32>
    %74 = tpu.reciprocal %73 {approx = true} : vector<8x1xf32> -> vector<8x1xf32>
    %75 = vector.broadcast %74 : vector<8x1xf32> to vector<8x16xf32>
    %76 = arith.mulf %71, %75 : vector<8x16xf32>
    %77 = arith.truncf %76 : vector<8x16xf32> to vector<8x16xbf16>
    %cst_28 = arith.constant dense<0.000000e+00> : vector<8x8xf32>
    %78 = tpu.matmul %77, %63, %cst_28 {dimension_numbers = #tpu.dot_dimension_numbers<[1], [0], [0], [1], [0, 0, 1, 1], [], []>} : vector<8x16xbf16>, vector<16x8xbf16>, vector<8x8xf32> -> vector<8x8xf32>
    %79 = arith.truncf %78 : vector<8x8xf32> to vector<8x8xbf16>
    %c16 = arith.constant 16 : index
    %c0_29 = arith.constant 0 : index
    %80 = vector.load %arg7[%c16, %c0_29] : memref<32x32xbf16, #tpu.memory_space<vmem>>, vector<8x32xbf16>
    %cst_30 = arith.constant dense<0.000000e+00> : vector<8x32xf32>
    %81 = tpu.matmul %79, %80, %cst_30 {dimension_numbers = #tpu.dot_dimension_numbers<[1], [0], [0], [1], [0, 0, 1, 1], [], []>} : vector<8x8xbf16>, vector<8x32xbf16>, vector<8x32xf32> -> vector<8x32xf32>
    %82 = arith.addf %60, %81 : vector<8x32xf32>
    %83 = vector.extract_strided_slice %12 {offsets = [0, 24], sizes = [8, 8], strides = [1, 1]} : vector<8x32xbf16> to vector<8x8xbf16>
    %84 = vector.extract_strided_slice %13 {offsets = [0, 24], sizes = [16, 8], strides = [1, 1]} : vector<16x32xbf16> to vector<16x8xbf16>
    %85 = vector.extract_strided_slice %14 {offsets = [0, 24], sizes = [16, 8], strides = [1, 1]} : vector<16x32xbf16> to vector<16x8xbf16>
    %cst_31 = arith.constant dense<0.000000e+00> : vector<8x16xf32>
    %86 = tpu.matmul %83, %84, %cst_31 {dimension_numbers = #tpu.dot_dimension_numbers<[1], [1], [0], [0], [0, 0, 1, 0], [], []>} : vector<8x8xbf16>, vector<16x8xbf16>, vector<8x16xf32> -> vector<8x16xf32>
    %87 = vector.broadcast %15 : vector<1x16xf32> to vector<8x16xf32>
    %88 = arith.addf %86, %87 : vector<8x16xf32>
    %cst_32 = arith.constant dense<0xFF800000> : vector<8xf32>
    %89 = vector.multi_reduction <maximumf>, %88, %cst_32 [1] : vector<8x16xf32> to vector<8xf32>
    %90 = vector.shape_cast %89 : vector<8xf32> to vector<8x1xf32>
    %91 = vector.broadcast %90 : vector<8x1xf32> to vector<8x16xf32>
    %92 = arith.subf %88, %91 : vector<8x16xf32>
    %93 = math.exp %92 : vector<8x16xf32>
    %cst_33 = arith.constant dense<0.000000e+00> : vector<8xf32>
    %94 = vector.multi_reduction <add>, %93, %cst_33 [1] : vector<8x16xf32> to vector<8xf32>
    %95 = vector.shape_cast %94 : vector<8xf32> to vector<8x1xf32>
    %96 = tpu.reciprocal %95 {approx = true} : vector<8x1xf32> -> vector<8x1xf32>
    %97 = vector.broadcast %96 : vector<8x1xf32> to vector<8x16xf32>
    %98 = arith.mulf %93, %97 : vector<8x16xf32>
    %99 = arith.truncf %98 : vector<8x16xf32> to vector<8x16xbf16>
    %cst_34 = arith.constant dense<0.000000e+00> : vector<8x8xf32>
    %100 = tpu.matmul %99, %85, %cst_34 {dimension_numbers = #tpu.dot_dimension_numbers<[1], [0], [0], [1], [0, 0, 1, 1], [], []>} : vector<8x16xbf16>, vector<16x8xbf16>, vector<8x8xf32> -> vector<8x8xf32>
    %101 = arith.truncf %100 : vector<8x8xf32> to vector<8x8xbf16>
    %c24 = arith.constant 24 : index
    %c0_35 = arith.constant 0 : index
    %102 = vector.load %arg7[%c24, %c0_35] : memref<32x32xbf16, #tpu.memory_space<vmem>>, vector<8x32xbf16>
    %cst_36 = arith.constant dense<0.000000e+00> : vector<8x32xf32>
    %103 = tpu.matmul %101, %102, %cst_36 {dimension_numbers = #tpu.dot_dimension_numbers<[1], [0], [0], [1], [0, 0, 1, 1], [], []>} : vector<8x8xbf16>, vector<8x32xbf16>, vector<8x32xf32> -> vector<8x32xf32>
    %104 = arith.addf %82, %103 : vector<8x32xf32>
    %105 = arith.addf %7, %104 : vector<8x32xf32>
    %c0_37 = arith.constant 0 : index
    %c0_38 = arith.constant 0 : index
    %106 = vector.load %arg14[%c0_37, %c0_38] : memref<1x32xf32, #tpu.memory_space<vmem>>, vector<1x32xf32>
    %c0_39 = arith.constant 0 : index
    %c0_40 = arith.constant 0 : index
    %107 = vector.load %arg15[%c0_39, %c0_40] : memref<1x32xf32, #tpu.memory_space<vmem>>, vector<1x32xf32>
    %cst_41 = arith.constant dense<0.000000e+00> : vector<8xf32>
    %108 = vector.multi_reduction <add>, %105, %cst_41 [1] : vector<8x32xf32> to vector<8xf32>
    %109 = vector.shape_cast %108 : vector<8xf32> to vector<8x1xf32>
    %cst_42 = arith.constant 3.200000e+01 : f32
    %110 = vector.broadcast %cst_42 : f32 to vector<8x1xf32>
    %111 = arith.divf %109, %110 : vector<8x1xf32>
    %112 = vector.broadcast %111 : vector<8x1xf32> to vector<8x32xf32>
    %113 = arith.subf %105, %112 : vector<8x32xf32>
    %114 = arith.mulf %113, %113 : vector<8x32xf32>
    %cst_43 = arith.constant dense<0.000000e+00> : vector<8xf32>
    %115 = vector.multi_reduction <add>, %114, %cst_43 [1] : vector<8x32xf32> to vector<8xf32>
    %116 = vector.shape_cast %115 : vector<8xf32> to vector<8x1xf32>
    %cst_44 = arith.constant 0.0322580636 : f32
    %117 = vector.broadcast %cst_44 : f32 to vector<8x1xf32>
    %118 = arith.mulf %116, %117 : vector<8x1xf32>
    %119 = math.sqrt %118 : vector<8x1xf32>
    %cst_45 = arith.constant 9.99999997E-7 : f32
    %120 = vector.broadcast %cst_45 : f32 to vector<8x1xf32>
    %121 = arith.addf %119, %120 : vector<8x1xf32>
    %122 = tpu.reciprocal %121 {approx = true} : vector<8x1xf32> -> vector<8x1xf32>
    %123 = vector.broadcast %106 : vector<1x32xf32> to vector<8x32xf32>
    %124 = arith.mulf %123, %113 : vector<8x32xf32>
    %125 = vector.broadcast %122 : vector<8x1xf32> to vector<8x32xf32>
    %126 = arith.mulf %124, %125 : vector<8x32xf32>
    %127 = vector.broadcast %107 : vector<1x32xf32> to vector<8x32xf32>
    %128 = arith.addf %126, %127 : vector<8x32xf32>
    %129 = arith.truncf %128 : vector<8x32xf32> to vector<8x32xbf16>
    %c0_46 = arith.constant 0 : index
    %c0_47 = arith.constant 0 : index
    %130 = vector.load %arg10[%c0_46, %c0_47] : memref<32x64xbf16, #tpu.memory_space<vmem>>, vector<32x64xbf16>
    %cst_48 = arith.constant dense<0.000000e+00> : vector<8x64xf32>
    %131 = tpu.matmul %129, %130, %cst_48 {dimension_numbers = #tpu.dot_dimension_numbers<[1], [0], [0], [1], [0, 0, 1, 1], [], []>} : vector<8x32xbf16>, vector<32x64xbf16>, vector<8x64xf32> -> vector<8x64xf32>
    %c0_49 = arith.constant 0 : index
    %c0_50 = arith.constant 0 : index
    %132 = vector.load %arg11[%c0_49, %c0_50] : memref<1x64xf32, #tpu.memory_space<vmem>>, vector<1x64xf32>
    %133 = vector.broadcast %132 : vector<1x64xf32> to vector<8x64xf32>
    %134 = arith.addf %131, %133 : vector<8x64xf32>
    %cst_51 = arith.constant 0.000000e+00 : f32
    %135 = vector.broadcast %cst_51 : f32 to vector<8x64xf32>
    %136 = arith.maximumf %134, %135 : vector<8x64xf32>
    %137 = arith.truncf %136 : vector<8x64xf32> to vector<8x64xbf16>
    %c0_52 = arith.constant 0 : index
    %c0_53 = arith.constant 0 : index
    %138 = vector.load %arg12[%c0_52, %c0_53] : memref<64x32xbf16, #tpu.memory_space<vmem>>, vector<64x32xbf16>
    %cst_54 = arith.constant dense<0.000000e+00> : vector<8x32xf32>
    %139 = tpu.matmul %137, %138, %cst_54 {dimension_numbers = #tpu.dot_dimension_numbers<[1], [0], [0], [1], [0, 0, 1, 1], [], []>} : vector<8x64xbf16>, vector<64x32xbf16>, vector<8x32xf32> -> vector<8x32xf32>
    %c0_55 = arith.constant 0 : index
    %c0_56 = arith.constant 0 : index
    %140 = vector.load %arg13[%c0_55, %c0_56] : memref<1x32xf32, #tpu.memory_space<vmem>>, vector<1x32xf32>
    %141 = vector.broadcast %140 : vector<1x32xf32> to vector<8x32xf32>
    %142 = arith.addf %139, %141 : vector<8x32xf32>
    %143 = arith.addf %105, %142 : vector<8x32xf32>
    %c0_57 = arith.constant 0 : index
    %c0_58 = arith.constant 0 : index
    %c0_59 = arith.constant 0 : index
    %144 = vector.load %arg16[%c0_57, %c0_58, %c0_59] : memref<1x8x32xf32, #tpu.memory_space<vmem>>, vector<1x8x32xf32>
    %145 = vector.shape_cast %144 : vector<1x8x32xf32> to vector<8x32xf32>
    %146 = vector.shape_cast %143 : vector<8x32xf32> to vector<1x8x32xf32>
    tpu.vector_store %arg16[%c0_57, %c0_58, %c0_59], %146 {strides = array<i32>} : memref<1x8x32xf32, #tpu.memory_space<vmem>>, vector<1x8x32xf32>,
    return
  }
  func.func @transform_0(%arg0: i32, %arg1: i32) -> (i32, i32, i32) {
    %c0_i32 = arith.constant 0 : i32
    %c0_i32_0 = arith.constant 0 : i32
    %c0_i32_1 = arith.constant 0 : i32
    return %arg0, %c0_i32, %c0_i32_0 : i32, i32, i32
  }
  func.func @transform_1(%arg0: i32, %arg1: i32) -> (i32, i32, i32) {
    %c0_i32 = arith.constant 0 : i32
    %c0_i32_0 = arith.constant 0 : i32
    %c0_i32_1 = arith.constant 0 : i32
    return %arg0, %c0_i32, %c0_i32_0 : i32, i32, i32
  }
  func.func @transform_2(%arg0: i32, %arg1: i32) -> (i32, i32) {
    %c0_i32 = arith.constant 0 : i32
    %c0_i32_0 = arith.constant 0 : i32
    %c0_i32_1 = arith.constant 0 : i32
    return %c0_i32, %c0_i32_0 : i32, i32
  }
  func.func @transform_3(%arg0: i32, %arg1: i32) -> (i32, i32) {
    %c0_i32 = arith.constant 0 : i32
    %c0_i32_0 = arith.constant 0 : i32
    %c0_i32_1 = arith.constant 0 : i32
    return %c0_i32, %c0_i32_0 : i32, i32
  }
  func.func @transform_4(%arg0: i32, %arg1: i32) -> (i32, i32) {
    %c0_i32 = arith.constant 0 : i32
    %c0_i32_0 = arith.constant 0 : i32
    %c0_i32_1 = arith.constant 0 : i32
    return %c0_i32, %c0_i32_0 : i32, i32
  }
  func.func @transform_5(%arg0: i32, %arg1: i32) -> (i32, i32) {
    %c0_i32 = arith.constant 0 : i32
    %c0_i32_0 = arith.constant 0 : i32
    %c0_i32_1 = arith.constant 0 : i32
    return %c0_i32, %c0_i32_0 : i32, i32
  }
  func.func @transform_6(%arg0: i32, %arg1: i32) -> (i32, i32) {
    %c0_i32 = arith.constant 0 : i32
    %c0_i32_0 = arith.constant 0 : i32
    %c0_i32_1 = arith.constant 0 : i32
    return %c0_i32, %c0_i32_0 : i32, i32
  }
  func.func @transform_7(%arg0: i32, %arg1: i32) -> (i32, i32) {
    %c0_i32 = arith.constant 0 : i32
    %c0_i32_0 = arith.constant 0 : i32
    %c0_i32_1 = arith.constant 0 : i32
    return %c0_i32, %c0_i32_0 : i32, i32
  }
  func.func @transform_8(%arg0: i32, %arg1: i32) -> (i32, i32) {
    %c0_i32 = arith.constant 0 : i32
    %c0_i32_0 = arith.constant 0 : i32
    %c0_i32_1 = arith.constant 0 : i32
    return %c0_i32, %c0_i32_0 : i32, i32
  }
  func.func @transform_9(%arg0: i32, %arg1: i32) -> (i32, i32) {
    %c0_i32 = arith.constant 0 : i32
    %c0_i32_0 = arith.constant 0 : i32
    %c0_i32_1 = arith.constant 0 : i32
    return %c0_i32, %c0_i32_0 : i32, i32
  }
  func.func @transform_10(%arg0: i32, %arg1: i32) -> (i32, i32) {
    %c0_i32 = arith.constant 0 : i32
    %c0_i32_0 = arith.constant 0 : i32
    %c0_i32_1 = arith.constant 0 : i32
    return %c0_i32, %c0_i32_0 : i32, i32
  }
  func.func @transform_11(%arg0: i32, %arg1: i32) -> (i32, i32) {
    %c0_i32 = arith.constant 0 : i32
    %c0_i32_0 = arith.constant 0 : i32
    %c0_i32_1 = arith.constant 0 : i32
    return %c0_i32, %c0_i32_0 : i32, i32
  }
  func.func @transform_12(%arg0: i32, %arg1: i32) -> (i32, i32) {
    %c0_i32 = arith.constant 0 : i32
    %c0_i32_0 = arith.constant 0 : i32
    %c0_i32_1 = arith.constant 0 : i32
    return %c0_i32, %c0_i32_0 : i32, i32
  }
  func.func @transform_13(%arg0: i32, %arg1: i32) -> (i32, i32) {
    %c0_i32 = arith.constant 0 : i32
    %c0_i32_0 = arith.constant 0 : i32
    %c0_i32_1 = arith.constant 0 : i32
    return %c0_i32, %c0_i32_0 : i32, i32
  }
  func.func @transform_14(%arg0: i32, %arg1: i32) -> (i32, i32, i32) {
    %c0_i32 = arith.constant 0 : i32
    %c0_i32_0 = arith.constant 0 : i32
    return %arg0, %arg1, %c0_i32 : i32, i32, i32
  }
}

</mosaic_0001>

<bundles_post_ra>
// kernel: tpu_custom_call.1
= control target key start
LH: loop header
LB: loop body
LE: loop exit
PB: predicated region body
PF: predicated region fallthrough
CT: control target
= control target key end

     0   :  { %s2425_s0 = inlined_call_operand.vmem [shape: f32[2,16,32], index: 0, kind: input, shape index: {}]   ;;  %s2426_s1 = inlined_call_operand.hbm [shape: s32[2,1,16], index: 1, kind: input, shape index: {}]   ;;  %s2427_s2 = inlined_call_operand.vmem [shape: bf16[32,32], index: 2, kind: input, shape index: {}]   ;;  %s2428_s3 = inlined_call_operand.hbm [shape: bf16[32,32], index: 3, kind: input, shape index: {}]   ;;  %s2429_s4 = inlined_call_operand.hbm [shape: bf16[32,32], index: 4, kind: input, shape index: {}]   ;;  %s2430_s5 = inlined_call_operand.hbm [shape: bf16[32,32], index: 5, kind: input, shape index: {}]   ;;  %s2431_s6 = inlined_call_operand.vmem [shape: f32[1,32], index: 6, kind: input, shape index: {}]   ;;  %s2432_s7 = inlined_call_operand.vmem [shape: f32[1,32], index: 7, kind: input, shape index: {}]   ;;  %s2433_s8 = inlined_call_operand.hbm [shape: bf16[32,64], index: 8, kind: input, shape index: {}]   ;;  %s2434_s9 = inlined_call_operand.vmem [shape: f32[1,64], index: 9, kind: input, shape index: {}]   ;;  %s2435_s10 = inlined_call_operand.vmem [shape: bf16[64,32], index: 10, kind: input, shape index: {}]   ;;  %s2436_s11 = inlined_call_operand.vmem [shape: f32[1,32], index: 11, kind: input, shape index: {}]   ;;  %s2437_s12 = inlined_call_operand.vmem [shape: f32[1,32], index: 12, kind: input, shape index: {}]   ;;  %s2438_s13 = inlined_call_operand.vmem [shape: f32[1,32], index: 13, kind: input, shape index: {}]   ;;  %s2439_s14 = inlined_call_operand.hbm [shape: f32[2,16,32], index: 14, kind: output, shape index: {}]  }
   0x1   :  { %2446 = sst [smem:[#allocation22_spill]] %s2425_s0 }
   0x2   :  { %2447 = sst [smem:[#allocation23_spill]] %s2426_s1 }
   0x3   :  { %2448 = sst [smem:[#allocation24_spill]] %s2427_s2 }
   0x4   :  { %2449 = sst [smem:[#allocation25_spill]] %s2428_s3 }
   0x5   :  { %2450 = sst [smem:[#allocation26_spill]] %s2429_s4 }
   0x6   :  { %2451 = sst [smem:[#allocation27_spill]] %s2430_s5 }
   0x7   :  { %2452 = sst [smem:[#allocation28_spill]] %s2431_s6 }
   0x8   :  { %2453 = sst [smem:[#allocation29_spill]] %s2432_s7 }
   0x9   :  { %2454 = sst [smem:[#allocation30_spill]] %s2433_s8 }
   0xa   :  { %2455 = sst [smem:[#allocation31_spill]] %s2434_s9 }
   0xb   :  { %2456 = sst [smem:[#allocation32_spill]] %s2435_s10 }
   0xc   :  { %2457 = sst [smem:[#allocation33_spill]] %s2436_s11 }
   0xd   :  { %2458 = sst [smem:[#allocation34_spill]] %s2437_s12 }
   0xe   :  { %2459 = sst [smem:[#allocation35_spill]] %s2438_s13 }
   0xf   :  { %2460 = sst [smem:[#allocation36_spill]] %s2439_s14 }
  0x10   :  { %19 = vsyncpa [#allocation7], 0 }
  0x11   :  { %21 = vsyncpa [#allocation7 + $0x1], 0 }
  0x12   :  { %22 = vsyncpa [#allocation10], 0 }
  0x13   :  { %23 = vsyncpa [#allocation13], 0 }
  0x14   :  { %24 = vsyncpa [#allocation8], 0 }
  0x15   :  { %26 = vsyncpa [#allocation8 + $0x1], 0  ;;  %s2065_s29 = smov 0   ;;  %s2067_s30 = smov 0  }
  0x16   :  { %s2069_s15 = smov 0   ;;  %s2071_s16 = smov 0  }
  0x17   :  { %s2073_s17 = smov 0   ;;  %s2075_s18 = smov 0  }
  0x18   :  { %s2077_s19 = smov 0   ;;  %s2079_s20 = smov 0  }
  0x19   :  { %s2081_s21 = smov 0   ;;  %s2083_s22 = smov 0  }
  0x1a   :  { %s2085_s23 = smov 0  }
  0x1b LB: > { %2461 = sst [smem:[#allocation20_spill]] %s1960_s19  ;;  %s1394_s24 = sadd.s32 4294967295, %s1976_s23   ;;  %s1976_s23 = sphi %s2085_s23, %s32_s23   ;;  %s1972_s22 = sphi %s2083_s22, %s2499_s22   ;;  %s1968_s21 = sphi %s2081_s21, %s2498_s21   ;;  %s1964_s20 = sphi %s2079_s20, %s2497_s20   ;;  %s1960_s19 = sphi %s2077_s19, %s2496_s19   ;;  %s1956_s18 = sphi %s2075_s18, %s2495_s18   ;;  %s1952_s17 = sphi %s2073_s17, %s2494_s17   ;;  %s1948_s16 = sphi %s2071_s16, %s2493_s16   ;;  %s1944_s15 = sphi %s2069_s15, %s2492_s15   ;;  %s1940_s30 = sphi %s2067_s30, %s2491_s30   ;;  %s1936_s29 = sphi %s2065_s29, %s2490_s29  }
  0x1c   : > { %p1396_p0 = scmp.ge.s32.totalorder %s1976_s23, 1  ;;  %p2122_p1 = scmp.eq.s32.totalorder %s1394_s24, 0 }
  0x1d   : > { %p2126_p2 = scmp.eq.s32.totalorder %s1394_s24, 3  ;;  %p381_p3 = scmp.lt.s32.totalorder %s1976_s23, 5 }
  0x1e   : > { %s2464_s3 = sld [smem:[#allocation25_spill]]  ;;  %s1978_s9 = smov [#allocation9]  }
  0x1f   : > { %p2134_p4 = pnand %p1396_p0, %p381_p3  ;;  %s397_s13 = sshll.u32 %s1978_s9, 4  ;;  %s398_s13 = int_to_ptr.vmem [resolvable:$true] %s397_s13 }
  0x20   : > { %s2467_s5 = sld [smem:[#allocation27_spill]]  ;;  %s1979_s28 = smov [#allocation12]  }
  0x21   : > { %p1526_p5 = pneg %p2134_p4  ;;  %s1980_s2 = smov 64  }
  0x22   : > { %s1981_s9 = smov 4   ;;  %s2468_s4 = sld [smem:[#allocation26_spill]] }
  0x23   : > { %p2142_p6 = pnand %p1526_p5, %p2122_p1  ;;  %s1982_s12 = smov [#allocation11]  }
  0x24   : > { %s395_s14 = sshll.u32 %s2464_s3, 4  ;;  %s425_s3 = sshll.u32 %s1979_s28, 4  ;;  %s396_s14 = int_to_ptr.hbm [resolvable:$true] %s395_s14  ;;  %s426_s3 = int_to_ptr.vmem [resolvable:$true] %s425_s3 }
  0x25   : > { %1529 = dma.hbm_to_vmem [thread:$0]  (!%p2142_p6), %s396_s14, 256, %s398_s13, [#allocation10], %s1980_s2, %s1980_s2, %s1981_s9  }
  0x26   : > { %s423_s27 = sshll.u32 %s2467_s5, 4  ;;  %s411_s28 = sshll.u32 %s1982_s12, 4  ;;  %s424_s27 = int_to_ptr.hbm [resolvable:$true] %s423_s27  ;;  %s412_s28 = int_to_ptr.vmem [resolvable:$true] %s411_s28 }
  0x27   : > { %1535 = dma.hbm_to_vmem [thread:$0]  (!%p2142_p6), %s424_s27, 256, %s426_s3, [#allocation13], %s1980_s2, %s1980_s2, %s1981_s9  }
  0x28   : > { %s409_s10 = sshll.u32 %s2468_s4, 4  ;;  %s2469_s8 = sld [smem:[#allocation30_spill]]  ;;  %s410_s10 = int_to_ptr.hbm [resolvable:$true] %s409_s10 }
  0x29   : > { %1532 = dma.hbm_to_vmem [thread:$0]  (!%p2142_p6), %s410_s10, 256, %s412_s28, [#allocation10], %s1980_s2, %s1980_s2, %s1981_s9  }
  0x2a   : > { %s1983_s6 = smov [#allocation14]   ;;  %s1395_s7 = sadd.s32 4294967294, %s1976_s23  }
  0x2b   : > { %s445_s3 = sshll.u32 %s1983_s6, 4  ;;  %s41_s5 = sadd.s32 1, %s1968_s21  ;;  %s446_s3 = int_to_ptr.vmem [resolvable:$true] %s445_s3 }
  0x2c   : > { %s44_s14 = sadd.s32 1, %s1972_s22  ;;  %p42_p7 = scmp.ge.s32.totalorder %s41_s5, 2 }
  0x2d   : > { %s77_s19 = sadd.s32 1, %s1956_s18  ;;  %p84_p8 = scmp.ne.s32.totalorder %s1956_s18, %s1952_s17 }
  0x2e   : > { %s443_s13 = sshll.u32 %s2469_s8, 4  ;;  %p85_p9 = scmp.eq.s32.totalorder %s1976_s23, 0  ;;  %s444_s13 = int_to_ptr.hbm [resolvable:$true] %s443_s13 }
  0x2f   : > { %1538 = dma.hbm_to_vmem [thread:$0]  (!%p2142_p6), %s444_s13, 256, %s446_s3, [#allocation13], %s1980_s2, %s1980_s2, %s1981_s9  }
  0x30   : > { %s2501_s5 = smov (%p42_p7, %s41_s5), 0  ;;  %s2503_s14 = smov (!%p42_p7, %s44_s14), %s1972_s22 }
  0x31   : > { %p2173_p10 = por %p85_p9, %p84_p8  ;;  %p90_p11 = scmp.ne.s32.totalorder %s1952_s17, %s1948_s16 }
  0x32   : > { %p46_p12 = scmp.ge.s32.totalorder %s2503_s14, 2  ;;  %s353_s24 = ssub.s32 %s1968_s21, %s2501_s5 }
  0x33   : > { %p2183_p13 = por %p2122_p1, %p90_p11  ;;  %s357_s9 = sadd.s32 1, %s1944_s15 }
  0x34   : > { %s2505_s14 = smov (%p46_p12, %s2503_s14), 0  ;;  %p367_p0 = scmp.ne.s32.totalorder %s1944_s15, %s1940_s30 }
  0x35   : > { %2472 = sst [smem:[#allocation21_spill]] %s2505_s14  ;;  %p373_p3 = scmp.ne.s32.totalorder %s1940_s30, %s1936_s29 }
  0x36   : > { %s74_s10 = ssub.s32 %s1972_s22, %s2505_s14  ;;  %p374_p5 = scmp.eq.s32.totalorder %s1395_s7, 3 }
  0x37   : > { %p75_p6 = scmp.eq.s32.totalorder %s74_s10, 0  ;;  %s354_s16 = sor.u32 %s353_s24, %s74_s10 }
  0x38   : > { %p355_p7 = scmp.eq.s32.totalorder %s354_s16, 0  ;;  %p2198_p8 = por %p2126_p2, %p367_p0 }
  0x39   : > { %s2203_s28 = scalar_select %p75_p6, %s1956_s18, %s77_s19  }
  0x3a   : > { %s2206_s13 = scalar_select %p355_p7, %s1944_s15, %s357_s9  }
  0x3b   : > { %p2208_p9 = por %p374_p5, %p373_p3  ;;  %p1551_p11 = scmp.lt.s32.totalorder %s1976_s23, 4 }
  0x3c   : > { %s482_s3 = sand.u32 1, %s1956_s18   ;;  %s2475_s1 = sld [smem:[#allocation23_spill]] }
  0x3d   : > { %s485_s26 = scalar_lea.vmem [#allocation6], %s482_s3  ;;  %p1540_p2 = pnand %p1551_p11, %p2173_p10 }
  0x3e   : > { %s492_s16 = sshll.u32 %s485_s26, 4  ;;  %s483_s19 = scalar_lea.sflag [#allocation7], %s482_s3  ;;  %s493_s16 = int_to_ptr.vmem [resolvable:$true] %s492_s16 }
  0x3f   : > { %s503_s9 = sand.u32 (!%p2134_p4), 1, %s1952_s17  }
  0x40   : > { %501 = sbr.rel (%p2134_p4) target bundleno = 2405 (0x965), region = 76  ;;  %s504_s8 = scalar_lea.sflag (!%p2134_p4), [#allocation7], %s503_s9 }
  0x41   : > { %s2223_s14 = scalar_lea.vmem (!%p2134_p4), [#allocation6], %s503_s9 }
  0x42   : > { %s488_s24 = scalar_lea.hbm %s2475_s1, %s1972_s22 }
  0x43   : > { %s490_s10 = sshll.u32 %s488_s24, 4  ;;  %s491_s10 = int_to_ptr.hbm [resolvable:$true] %s490_s10 }
  0x44   : > { %1542 = dma.hbm_to_vmem [thread:$0]  (!%p1540_p2), %s491_s10, 16, %s493_s16, %s483_s19  }
  0x45   : > { %1919 = dma.done.wait (%p2183_p13), %s504_s8, 16  }
  0x46   : > { %1921 = vsyncadd (%p2183_p13), %s504_s8, 4294967280 }
  0x47   : > { %1923 = dma.done.wait (%p2122_p1), [#allocation10], 512  }
  0x48   : > { %1925 = vsyncadd (%p2122_p1), [#allocation10], 4294966784 }
  0x49   : > { %1927 = dma.done.wait (%p2122_p1), [#allocation13], 512  }
  0x4a   : > { %1929 = vsyncadd (%p2122_p1), [#allocation13], 4294966784  ;;  %s2445_s4 = sand.u32 1, %s1940_s30   ;;  %p576_p4 = scmp.lt.s32.totalorder %s1964_s20, 1 }
  0x4b   : > { %s2241_s8 = sshll.u32 %s2445_s4, 3  ;;  %s2476_s0 = sld [smem:[#allocation22_spill]] }
  0x4c   : > { %s577_s11 = scalar_select %p576_p4, %s1964_s20, 1 }
  0x4d   : > { %s575_s24 = scalar_lea.vmem [#allocation15], %s2241_s8  ;;  %s2477_s25 = sld [smem:[#allocation20_spill]] }
  0x4e   : > { %s1491_s2 = sshll.u32 %s577_s11, 4 }
  0x51   : > { %s2247_s7 = scalar_lea.vmem %s2476_s0, %s1491_s2 }
  0x53   : > { %p1410_p1 = scmp.ne.s32.totalorder %s2477_s25, 0 }
  0x54   : > { %s2478_s16 = sld [smem:[#allocation28_spill]] (!%p1410_p1) }
  0x55   : > { %585 = sbr.rel (%p1410_p1) target bundleno = 519 (0x207), region = 100  ;;  %s2479_s11 = sld [smem:[#allocation29_spill]] (!%p1410_p1) }
  0x5a   : > { %v586_v0 = vld [vmem:[%s2247_s7] sm:$0xff]  ;;  %vm590_vm0 = vcmask 261120   ;;  %v587_v2 = vld [vmem:[%s2247_s7 + $0x8] sm:$0xff]  ;;  %v1984_v4 = vmov 32.0   ;;  %v1495_v22 = vld [vmem:[#allocation11 + $0x8] sm:$0xff]  ;;  %vm660_vm6 = vcmask 257024  }
  0x5b   : > { %v591_v1 = vsel %vm590_vm0, %v586_v0, 0.0  ;;  %v594_v3 = vsel %vm590_vm0, %v587_v2, 0.0  ;;  %1659 = vrcp.f32 %v1984_v4  ;;  %v1493_v21 = vld [vmem:[#allocation9 + $0x8] sm:$0xff]  ;;  %727 = vmatpush.bf16.msra.mxu1 %v1495_v22  ;;  %v1492_v23 = vld [vmem:[#allocation9] sm:$0xff]  ;;  %v1494_v24 = vld [vmem:[#allocation11] sm:$0xff]  ;;  %vm742_vm8 = vcmask 122880  }
  0x5c   : > { %592 = vadd.xlane.f32.xlu0 %v591_v1  ;;  %693 = vmatpush.bf16.msra.mxu0 %v1493_v21  ;;  %v1657_v46 = vld [vmem:[%s2478_s16] ss:$0 sm:$0xff] }
  0x5d   : > { %v1658_v52 = vld [vmem:[%s2479_s11] ss:$0 sm:$0xff] }
  0x5f   : > { %728 = vmatpush.bf16.msra.mxu1 %v1494_v24 }
  0x60   : > { %694 = vmatpush.bf16.msra.mxu0 %v1492_v23 }
  0x61   : > { %v1660_v5 = vpop.eup %1659 }
  0x62   : > { %v598_v6 = vmul.f32 32.0, %v1660_v5  ;;  %vm602_vm1 = vweird.f32 %v1660_v5 }
  0x64   : > { %595 = vadd.xlane.f32.xlu0 %v594_v3  ;;  %v599_v7 = vsub.f32 1.0, %v598_v6  ;;  %v1985_v3 = vmov 0.0  }
  0x66   : > { %v600_v8 = vmul.f32 %v1660_v5, %v599_v7 }
  0x68   : > { %v601_v9 = vadd.f32 %v1660_v5, %v600_v8 }
  0x6a   : > { %v603_v10 = vsel %vm602_vm1, %v1660_v5, %v601_v9 }
  0xcf   : > { %v593_v11 = vpop.xlane.xlu0 %592 }
  0xd0   : > { %v604_v12 = vmul.f32 %v603_v10, %v593_v11 }
  0xd2   : > { %v606_v13 = vsub.f32 %v586_v0, %v604_v12 }
  0xd4   : > { %v608_v14 = vmul.f32 %v606_v13, %v606_v13  ;;  %v649_v50 = vmul.f32 %v1657_v46, %v606_v13 }
  0xd6   : > { %v610_v15 = vsel %vm590_vm0, %v608_v14, 0.0 }
  0xd7   : > { %611 = vadd.xlane.f32.xlu1 %v610_v15  ;;  %v596_v16 = vpop.xlane.xlu0 %595 }
  0xd8   : > { %v605_v17 = vmul.f32 %v603_v10, %v596_v16 }
  0xda   : > { %v607_v18 = vsub.f32 %v587_v2, %v605_v17  ;;  %v739_v2 = vld [vmem:[%s2223_s14] sm:$0x1] }
  0xdb   : > { %vm740_vm7 = vcmp.eq.s32.totalorder %v739_v2, 0 }
  0xdc   : > { %v609_v19 = vmul.f32 %v607_v18, %v607_v18  ;;  %v650_v58 = vmul.f32 %v1657_v46, %v607_v18  ;;  %v741_v4 = vsel %vm740_vm7, -1e+09, %v1985_v3 }
  0xdd   : > { %743 = vst.msk [vmem:[#allocation5] sm:$0x1] %vm742_vm8, %v741_v4 }
  0xde   : > { %v613_v20 = vsel %vm590_vm0, %v609_v19, 0.0 }
  0xdf   : > { %614 = vadd.xlane.f32.xlu1 %v613_v20 }
 0x14a   : > { %v612_v25 = vpop.xlane.xlu1 %611 }
 0x14b   : > { %v616_v26 = vmul.f32 0.032258064, %v612_v25 }
 0x14d   : > { %1661 = vrsqrt.f32 %v616_v26  ;;  %vm625_vm2 = vcmp.eq.f32.partialorder %v616_v26, inf  ;;  %v628_v39 = vand.u32 2147483648, %v616_v26  ;;  %vm627_vm3 = vcmp.eq.f32.partialorder %v616_v26, 0.0 }
 0x152   : > { %v615_v27 = vpop.xlane.xlu1 %614 }
 0x153   : > { %v1662_v28 = vpop.eup %1661  ;;  %v617_v29 = vmul.f32 0.032258064, %v615_v27 }
 0x154   : > { %v619_v30 = vmul.f32 %v1662_v28, %v616_v26 }
 0x155   : > { %1663 = vrsqrt.f32 %v617_v29  ;;  %vm637_vm4 = vcmp.eq.f32.partialorder %v617_v29, inf  ;;  %v640_v48 = vand.u32 2147483648, %v617_v29  ;;  %vm639_vm5 = vcmp.eq.f32.partialorder %v617_v29, 0.0 }
 0x156   : > { %v620_v31 = vmul.f32 %v1662_v28, %v619_v30 }
 0x158   : > { %v621_v32 = vmul.f32 0.5, %v620_v31 }
 0x15a   : > { %v622_v33 = vsub.f32 1.5, %v621_v32 }
 0x15b   : > { %v1664_v34 = vpop.eup %1663 }
 0x15c   : > { %v631_v35 = vmul.f32 %v1664_v34, %v617_v29  ;;  %v623_v36 = vmul.f32 %v1662_v28, %v622_v33 }
 0x15e   : > { %v632_v37 = vmul.f32 %v1664_v34, %v631_v35  ;;  %v624_v38 = vmul.f32 %v623_v36, %v616_v26 }
 0x160   : > { %v633_v40 = vmul.f32 0.5, %v632_v37  ;;  %v626_v41 = vsel %vm625_vm2, %v616_v26, %v624_v38 }
 0x161   : > { %v629_v42 = vsel %vm627_vm3, %v628_v39, %v626_v41 }
 0x162   : > { %v634_v43 = vsub.f32 1.5, %v633_v40  ;;  %v642_v44 = vadd.f32 1e-06, %v629_v42 }
 0x164   : > { %v635_v45 = vmul.f32 %v1664_v34, %v634_v43  ;;  %1665 = vrcp.f32 %v642_v44 }
 0x166   : > { %v636_v47 = vmul.f32 %v635_v45, %v617_v29 }
 0x168   : > { %v638_v49 = vsel %vm637_vm4, %v617_v29, %v636_v47 }
 0x169   : > { %v641_v51 = vsel %vm639_vm5, %v640_v48, %v638_v49 }
 0x16a   : > { %v1666_v53 = vpop.eup %1665  ;;  %v643_v54 = vadd.f32 1e-06, %v641_v51 }
 0x16b   : > { %v651_v55 = vmul.f32 %v1666_v53, %v649_v50 }
 0x16c   : > { %1667 = vrcp.f32 %v643_v54 }
 0x16d   : > { %v656_v56 = vadd.f32 %v1658_v52, %v651_v55 }
 0x16f   : > { %v658_v57 = vpack.c.bf16 %v656_v56, %v656_v56 }
 0x171   : > { %661 = vst.msk [vmem:[#allocation2] sm:$0xf] %vm660_vm6, %v658_v57  ;;  %v669_v63 = vunpack.c.l.b16 %v658_v57 }
 0x172   : > { %v1668_v59 = vpop.eup %1667 }
 0x173   : > { %v652_v60 = vmul.f32 %v1668_v59, %v650_v58 }
 0x175   : > { %v657_v61 = vadd.f32 %v1658_v52, %v652_v60 }
 0x177   : > { %v659_v62 = vpack.c.bf16 %v657_v61, %v657_v61 }
 0x179   : > { %662 = vst.msk [vmem:[#allocation2 + $0x4] sm:$0xf] %vm660_vm6, %v659_v62  ;;  %v670_v0 = vunpack.c.l.b16 %v659_v62 }
 0x17b   : > { %v671_v1 = vpack.c.b16 %v670_v0, %v669_v63 }
 0x17d   : > { %1419 = vmatmul.msk.bf16.vlgmr.msra.gmra.mxu0 %vm590_vm0, %v671_v1  ;;  %1428 = vmatmul.msk.bf16.vlgmr.msra.gmra.mxu1 %vm590_vm0, %v671_v1 }
 0x1fa   : > { %v696_v5 = vpop.f32.mrf.mxu0  ;;  %v730_v6 = vpop.f32.mrf.mxu1 }
 0x1fb   : > { %v701_v7 = vpack.c.bf16 %v696_v5, %v696_v5  ;;  %v735_v8 = vpack.c.bf16 %v730_v6, %v730_v6 }
 0x1fd   : > { %703 = vst.msk [vmem:[#allocation3] sm:$0xf] %vm660_vm6, %v701_v7 }
 0x1fe   : > { %737 = vst.msk [vmem:[#allocation4] sm:$0xf] %vm660_vm6, %v735_v8 }
 0x202   : > { %v698_v9 = vpop.f32.mrf.mxu0  ;;  %v732_v10 = vpop.f32.mrf.mxu1 }
 0x203   : > { %v702_v11 = vpack.c.bf16 %v698_v9, %v698_v9  ;;  %v736_v12 = vpack.c.bf16 %v732_v10, %v732_v10 }
 0x205   : > { %704 = vst.msk [vmem:[#allocation3 + $0x4] sm:$0xf] %vm660_vm6, %v702_v11 }
 0x206   : > { %738 = vst.msk [vmem:[#allocation4 + $0x4] sm:$0xf] %vm660_vm6, %v736_v12 }
 0x207 PF: > { %s2480_s27 = sld [smem:[#allocation24_spill]]  ;;  %vm799_vm9 = vcmask 64512   ;;  %s1986_s9 = smov 120   ;;  %vm768_vm10 = vcmask 261120   ;;  %v2291_v26 = vld [vmem:[#allocation5] ss:$0 sm:$0xff] }
 0x208   : > { %s2481_s3 = sld [smem:[#allocation20_spill]]  ;;  %s1987_s14 = smov 112   ;;  %vm819_vm11 = vcmask 130048   ;;  %v855_v55 = vld [vmem:[#allocation12] sm:$0xf]  ;;  %vm918_vm12 = vcmask 1043456  }
 0x209   : > { %s1988_s2 = smov 104   ;;  %v939_v56 = vsel %vm918_vm12, %v855_v55, 0  ;;  %v914_v6 = vld [vmem:[#allocation12 + $0x4] sm:$0xf]  ;;  %s2482_s26 = sld [smem:[#allocation32_spill]]  ;;  %vm1224_vm0 = vcmask 523264  }
 0x20a   : > { %v920_v7 = vsel %vm918_vm12, %v914_v6, 0  ;;  %s1258_s0 = sshll.u32 %s575_s24, 4  ;;  %s1259_s0 = int_to_ptr.vmem [resolvable:$true] %s1258_s0 }
 0x20c   : > { %v1498_v14 = vld [vmem:[#allocation3] sm:$0xff] }
 0x20d   : > { %v1497_v13 = vld [vmem:[%s2480_s27 + $0x8] sm:$0xff]  ;;  %v1496_v15 = vld [vmem:[%s2480_s27] sm:$0xff]  ;;  %v804_v16 = vsel %vm799_vm9, %v1498_v14, 0  ;;  %861 = vrot.lane.b32.xlu1 %v1498_v14, %s1986_s9  ;;  %956 = vrot.lane.b32.xlu2 %v1498_v14, %s1987_s14  ;;  %v2299_v40 = vld [vmem:[#allocation4] sm:$0xff] }
 0x20e   : > { %s1429_s25 = sshll.u32 %s2481_s3, 3  ;;  %778 = vmatpush.bf16.msra.mxu0 %v1497_v13  ;;  %813 = vmatpush.bf16.xpose.msra.mxu1 %v804_v16 }
 0x20f   : > { %s747_s10 = sshra.s32 %s1429_s25, 3  ;;  %848 = vmatpush.bf16.msra.mxu2 %v2299_v40 }
 0x210   : > { %s1430_s19 = sshll.u32 %s747_s10, 2  ;;  %s745_s10 = scalar_lea.vmem %s2247_s7, %s1429_s25 }
 0x211   : > { %s750_s11 = scalar_lea.vmem [#allocation2], %s1430_s19  ;;  %s2484_s7 = sld [smem:[#allocation35_spill]] }
 0x212   : > { %779 = vmatpush.bf16.msra.mxu0 %v1496_v15  ;;  %v751_v17 = vld [vmem:[%s750_s11] sm:$0xf] }
 0x215   : > { %1439 = vmatmul.msk.bf16.vlgmr.msra.gmra.mxu0 %vm768_vm10, %v751_v17  ;;  %1032 = vrot.lane.b32.xlu2 %v1498_v14, %s1988_s2 }
 0x216   : > { %948 = vmatpush.bf16.msrb.mxu1 %v939_v56  ;;  %929 = vmatpush.bf16.msrb.mxu0 %v920_v7  ;;  %v1501_v7 = vld [vmem:[#allocation14 + $0x8] sm:$0xff] }
 0x267   : > { %v957_v41 = vpop.permute.xlu2 %956 }
 0x268   : > { %v962_v42 = vsel %vm799_vm9, %v957_v41, 0  ;;  %v1009_v41 = vld [vmem:[#allocation12 + $0x8] sm:$0xf] }
 0x26f   : > { %v1033_v43 = vpop.permute.xlu2 %1032 }
 0x270   : > { %v1038_v54 = vsel %vm799_vm9, %v1033_v43, 0 }
 0x27f   : > { %v862_v18 = vpop.permute.xlu1 %861 }
 0x280   : > { %v867_v19 = vsel %vm799_vm9, %v862_v18, 0 }
 0x281   : > { %876 = vmatpush.bf16.xpose.msra.mxu3 %v867_v19 }
 0x289   : > { %971 = vmatpush.bf16.xpose.msrb.mxu3 %v962_v42  ;;  %v1014_v42 = vsel %vm918_vm12, %v1009_v41, 0 }
 0x28a   : > { %1023 = vmatpush.bf16.msra.mxu0 %v1014_v42 }
 0x292   : > { %v781_v20 = vpop.f32.mrf.mxu0 }
 0x293   : > { %v785_v21 = vpack.c.bf16 %v781_v20, %v781_v20 }
 0x295   : > { %v857_v22 = vunpack.c.l.b16 %v785_v21  ;;  %1444 = vmatmul.msk.bf16.vlgmr.msra.gmra.mxu1 %vm799_vm9, %v785_v21 }
 0x296   : > { %1047 = vmatpush.bf16.xpose.msra.mxu1 %v1038_v54  ;;  %v746_v54 = vld [vmem:[%s745_s10] sm:$0xff]  ;;  %s1487_s10 = sshll.u32 %s1964_s20, 1  ;;  %s2488_s20 = sand.u32 1, %s1940_s30  }
 0x297   : > { %v858_v23 = vpack.c.b16 %v857_v22, %v857_v22 }
 0x299   : > { %859 = vrot.lane.b32.xlu1 %v858_v23, %s1986_s9 }
 0x29a   : > { %v783_v24 = vpop.f32.mrf.mxu0 }
 0x2a1   : > { %1030 = vrot.lane.b32.xlu1 %v858_v23, %s1988_s2 }
 0x30b   : > { %v860_v25 = vpop.permute.xlu1 %859 }
 0x30c   : > { %1450 = vmatmul.msk.bf16.vlgmr.msra.gmra.mxu3 %vm799_vm9, %v860_v25 }
 0x312   : > { %v815_v27 = vpop.f32.mrf.mxu1 }
 0x313   : > { %v816_v28 = vadd.f32 %v2291_v26, %v815_v27  ;;  %v1031_v5 = vpop.permute.xlu1 %1030 }
 0x315   : > { %v820_v29 = vsel %vm819_vm11, %v816_v28, -inf }
 0x316   : > { %821 = vmax.xlane.f32.xlu0 %v820_v29 }
 0x31a   : > { %v817_v30 = vpop.f32.mrf.mxu1 }
 0x389   : > { %v822_v31 = vpop.xlane.xlu0 %821 }
 0x38a   : > { %v823_v32 = vsub.f32 %v816_v28, %v822_v31 }
 0x38c   : > { %v824_v33 = vmul.f32 1.442695, %v823_v32 }
 0x38e   : > { %1674 = vpow2.f32 %v824_v33 }
 0x38f   : > { %v878_v34 = vpop.f32.mrf.mxu3 }
 0x390   : > { %v879_v35 = vadd.f32 %v2291_v26, %v878_v34 }
 0x392   : > { %v882_v36 = vsel %vm819_vm11, %v879_v35, -inf }
 0x393   : > { %883 = vmax.xlane.f32.xlu2 %v882_v36 }
 0x394   : > { %v1675_v37 = vpop.eup %1674 }
 0x395   : > { %v826_v38 = vsel %vm819_vm11, %v1675_v37, 0.0 }
 0x396   : > { %827 = vadd.xlane.f32.xlu0 %v826_v38 }
 0x397   : > { %v880_v39 = vpop.f32.mrf.mxu3 }
 0x398   : > { %v1085_v39 = vld [vmem:[#allocation12 + $0xc] sm:$0xf] }
 0x3aa   : > { %954 = vrot.lane.b32.xlu0 %v858_v23, %s1987_s14 }
 0x406   : > { %v884_v44 = vpop.xlane.xlu2 %883 }
 0x407   : > { %v885_v45 = vsub.f32 %v879_v35, %v884_v44 }
 0x409   : > { %v886_v46 = vmul.f32 1.442695, %v885_v45  ;;  %v828_v47 = vpop.xlane.xlu0 %827 }
 0x40a   : > { %1676 = vrcp.f32 %v828_v47 }
 0x40b   : > { %1678 = vpow2.f32 %v886_v46 }
 0x410   : > { %v1677_v48 = vpop.eup %1676 }
 0x411   : > { %v1679_v49 = vpop.eup %1678  ;;  %v830_v50 = vmul.f32 %v1677_v48, %v1675_v37 }
 0x412   : > { %v888_v51 = vsel %vm819_vm11, %v1679_v49, 0.0 }
 0x413   : > { %889 = vadd.xlane.f32.xlu2 %v888_v51  ;;  %v831_v52 = vpack.c.bf16 %v830_v50, %v830_v50 }
 0x415   : > { %1449 = vmatmul.msk.bf16.vlgmr.msra.gmra.mxu2 %vm819_vm11, %v831_v52 }
 0x41c   : > { %v955_v53 = vpop.permute.xlu0 %954 }
 0x41d   : > { %1454 = vmatmul.msk.bf16.vlgmr.msrb.gmra.mxu3 %vm799_vm9, %v955_v53 }
 0x42b   : > { %894 = vrot.lane.b32.xlu2 %v2299_v40, %s1986_s9  ;;  %s2486_s9 = sld [smem:[#allocation33_spill]] }
 0x486   : > { %v890_v57 = vpop.xlane.xlu2 %889 }
 0x487   : > { %1680 = vrcp.f32 %v890_v57 }
 0x48d   : > { %v1681_v58 = vpop.eup %1680 }
 0x48e   : > { %v892_v59 = vmul.f32 %v1681_v58, %v1679_v49  ;;  %v895_v60 = vpop.permute.xlu2 %894 }
 0x48f   : > { %907 = vmatpush.bf16.msrb.mxu2 %v895_v60 }
 0x490   : > { %v893_v61 = vpack.c.bf16 %v892_v59, %v892_v59  ;;  %v1989_v59 = vmov 32.0  }
 0x492   : > { %1451 = vmatmul.msk.bf16.vlgmr.msrb.gmra.mxu2 %vm819_vm11, %v893_v61 }
 0x498   : > { %v850_v62 = vpop.f32.mrf.mxu2 }
 0x499   : > { %v854_v63 = vpack.c.bf16 %v850_v62, %v850_v62 }
 0x49b   : > { %1453 = vmatmul.msk.bf16.vlgmr.msrb.gmra.mxu1 %vm799_vm9, %v854_v63 }
 0x4a0   : > { %v852_v0 = vpop.f32.mrf.mxu2  ;;  %v973_v1 = vpop.f32.mrf.mxu3 }
 0x4a1   : > { %v974_v2 = vadd.f32 %v2291_v26, %v973_v1 }
 0x4a3   : > { %v977_v3 = vsel %vm819_vm11, %v974_v2, -inf }
 0x4a4   : > { %978 = vmax.xlane.f32.xlu0 %v977_v3 }
 0x4a8   : > { %v975_v4 = vpop.f32.mrf.mxu3 }
 0x4ab   : > { %1457 = vmatmul.msk.bf16.vlgmr.msra.gmra.mxu1 %vm799_vm9, %v1031_v5 }
 0x4b8   : > { %1065 = vrot.lane.b32.xlu0 %v2299_v40, %s1988_s2  ;;  %s2485_s2 = sld [smem:[#allocation31_spill]] }
 0x515   : > { %v909_v8 = vpop.f32.mrf.mxu2 }
 0x516   : > { %v913_v9 = vpack.c.bf16 %v909_v8, %v909_v8  ;;  %v1500_v8 = vld [vmem:[#allocation14] sm:$0xff] }
 0x517   : > { %v979_v12 = vpop.xlane.xlu0 %978 }
 0x518   : > { %1452 = vmatmul.msk.bf16.vlgmr.msrb.gmra.mxu0 %vm799_vm9, %v913_v9  ;;  %v950_v10 = vpop.f32.mrf.mxu1  ;;  %v980_v14 = vsub.f32 %v974_v2, %v979_v12 }
 0x519   : > { %1179 = vmatpush.bf16.msrb.mxu0 %v1501_v7 }
 0x51a   : > { %v981_v15 = vmul.f32 1.442695, %v980_v14 }
 0x51c   : > { %1682 = vpow2.f32 %v981_v15 }
 0x51d   : > { %v911_v11 = vpop.f32.mrf.mxu2  ;;  %1180 = vmatpush.bf16.msrb.mxu0 %v1500_v8 }
 0x51e   : > { %v1505_v11 = vld [vmem:[%s2482_s26 + $0x18] sm:$0xff] }
 0x51f   : > { %1232 = vmatpush.bf16.msrb.mxu1 %v1505_v11 }
 0x520   : > { %v952_v13 = vpop.f32.mrf.mxu1 }
 0x521   : > { %v1504_v13 = vld [vmem:[%s2482_s26 + $0x10] sm:$0xff] }
 0x522   : > { %v1683_v19 = vpop.eup %1682 }
 0x523   : > { %v983_v21 = vsel %vm819_vm11, %v1683_v19, 0.0  ;;  %1233 = vmatpush.bf16.msrb.mxu1 %v1504_v13 }
 0x528   : > { %v1049_v16 = vpop.f32.mrf.mxu1 }
 0x529   : > { %v1050_v17 = vadd.f32 %v2291_v26, %v1049_v16 }
 0x52a   : > { %v1066_v26 = vpop.permute.xlu0 %1065 }
 0x52b   : > { %v1053_v18 = vsel %vm819_vm11, %v1050_v17, -inf  ;;  %1078 = vmatpush.bf16.msra.mxu3 %v1066_v26 }
 0x52c   : > { %1054 = vmax.xlane.f32.xlu1 %v1053_v18 }
 0x530   : > { %v1051_v20 = vpop.f32.mrf.mxu1 }
 0x534   : > { %984 = vadd.xlane.f32.xlu1 %v983_v21 }
 0x595   : > { %v931_v22 = vpop.f32.mrf.mxu0 }
 0x596   : > { %v951_v51 = vadd.f32 %v950_v10, %v931_v22 }
 0x59d   : > { %v933_v23 = vpop.f32.mrf.mxu0 }
 0x59f   : > { %v1055_v24 = vpop.xlane.xlu1 %1054 }
 0x5a0   : > { %v1056_v25 = vsub.f32 %v1050_v17, %v1055_v24 }
 0x5a2   : > { %v1057_v27 = vmul.f32 1.442695, %v1056_v25 }
 0x5a4   : > { %1684 = vpow2.f32 %v1057_v27  ;;  %v1671_v27 = vld [vmem:[%s2484_s7] ss:$0 sm:$0xff]  ;;  %s1254_s7 = sadd.s32 %s2481_s3, %s1487_s10  ;;  %s1244_s3 = scalar_lea.sflag [#allocation8], %s2488_s20 }
 0x5a5   : > { %s1488_s25 = sshll.u32 %s1254_s7, 3 }
 0x5a7   : > { %v985_v30 = vpop.xlane.xlu1 %984 }
 0x5aa   : > { %v1685_v28 = vpop.eup %1684 }
 0x5ab   : > { %v1059_v29 = vsel %vm819_vm11, %v1685_v28, 0.0 }
 0x5ac   : > { %1060 = vadd.xlane.f32.xlu1 %v1059_v29 }
 0x5c5   : > { %989 = vrot.lane.b32.xlu1 %v2299_v40, %s1987_s14  ;;  %v1090_v40 = vsel %vm918_vm12, %v1085_v39, 0  ;;  %s2483_s14 = sld [smem:[#allocation34_spill]]  ;;  %v1673_v39 = vld [vmem:[%s2486_s9] ss:$0 sm:$0xff] }
 0x5cb   : > { %v1670_v24 = vld [vmem:[%s2483_s14] ss:$0 sm:$0xff]  ;;  %s2487_s14 = sld [smem:[#allocation36_spill]] }
 0x5d1   : > { %s1866_s16 = scalar_lea.hbm %s2487_s14, 32 }
 0x61f   : > { %v1061_v31 = vpop.xlane.xlu1 %1060 }
 0x620   : > { %1686 = vrcp.f32 %v1061_v31  ;;  %v1503_v31 = vld [vmem:[%s2482_s26 + $0x8] sm:$0xff] }
 0x621   : > { %1688 = vrcp.f32 %v985_v30  ;;  %1234 = vmatpush.bf16.msrb.mxu1 %v1503_v31 }
 0x622   : > { %1690 = vrcp.f32 %v1989_v59 }
 0x626   : > { %v1687_v32 = vpop.eup %1686 }
 0x627   : > { %v1063_v33 = vmul.f32 %v1687_v32, %v1685_v28  ;;  %v1689_v35 = vpop.eup %1688  ;;  %v1502_v32 = vld [vmem:[%s2482_s26] sm:$0xff] }
 0x628   : > { %v987_v36 = vmul.f32 %v1689_v35, %v1683_v19  ;;  %v1691_v60 = vpop.eup %1690  ;;  %1235 = vmatpush.bf16.msrb.mxu1 %v1502_v32 }
 0x629   : > { %v1064_v34 = vpack.c.bf16 %v1063_v33, %v1063_v33  ;;  %v1113_v61 = vmul.f32 32.0, %v1691_v60  ;;  %vm1117_vm13 = vweird.f32 %v1691_v60  ;;  %v1672_v33 = vld [vmem:[%s2485_s2] ss:$0 sm:$0xff]  ;;  %s1256_s2 = scalar_lea.hbm %s2487_s14, %s1488_s25 }
 0x62a   : > { %v988_v38 = vpack.c.bf16 %v987_v36, %v987_v36  ;;  %s1260_s1 = sshll.u32 %s1256_s2, 4  ;;  %s1261_s1 = int_to_ptr.hbm [resolvable:$true] %s1260_s1 }
 0x62b   : > { %1458 = vmatmul.msk.bf16.vlgmr.msra.gmra.mxu3 %vm819_vm11, %v1064_v34  ;;  %v1114_v62 = vsub.f32 1.0, %v1113_v61  ;;  %s1860_s10 = sshra.s32 %s1261_s1, 4  ;;  %s1861_s10 = int_to_ptr.hbm [resolvable:$true] %s1860_s10 }
 0x62c   : > { %s1862_s7 = scalar_lea.hbm %s1861_s10, 8  ;;  %p1867_p0 = scmp.lt.s32.totalorder %s1861_s10, %s2487_s14 }
 0x62d   : > { %v1115_v63 = vmul.f32 %v1691_v60, %v1114_v62  ;;  %p1863_p10 = scmp.ne.s32.totalorder %s1861_s10, %s1862_s7  ;;  %p1868_p3 = scmp.lt.s32.totalorder %s1866_s16, %s1862_s7 }
 0x62f   : > { %v1116_v0 = vadd.f32 %v1691_v60, %v1115_v63  ;;  %p1864_p12 = pnand %p1863_p10, %p2198_p8  ;;  %p1869_p5 = por %p1868_p3, %p1867_p0 }
 0x631   : > { %v1118_v1 = vsel %vm1117_vm13, %v1691_v60, %v1116_v0  ;;  %p1865_p13 = pneg %p1864_p12 }
 0x633   : > { %p1870_p6 = pnand %p1869_p5, %p1865_p13 }
 0x637   : > { %v990_v37 = vpop.permute.xlu1 %989 }
 0x638   : > { %1002 = vmatpush.bf16.msra.mxu2 %v990_v37 }
 0x63b   : > { %1455 = vmatmul.msk.bf16.vlgmr.msra.gmra.mxu2 %vm819_vm11, %v988_v38 }
 0x63c   : > { %1099 = vmatpush.bf16.msrb.mxu2 %v1090_v40 }
 0x6ae   : > { %v1080_v43 = vpop.f32.mrf.mxu3 }
 0x6af   : > { %v1084_v44 = vpack.c.bf16 %v1080_v43, %v1080_v43 }
 0x6b1   : > { %1459 = vmatmul.msk.bf16.vlgmr.msrb.gmra.mxu2 %vm799_vm9, %v1084_v44 }
 0x6b6   : > { %v1082_v45 = vpop.f32.mrf.mxu3 }
 0x6be   : > { %v1004_v46 = vpop.f32.mrf.mxu2 }
 0x6bf   : > { %v1008_v47 = vpack.c.bf16 %v1004_v46, %v1004_v46 }
 0x6c1   : > { %1456 = vmatmul.msk.bf16.vlgmr.msra.gmra.mxu0 %vm799_vm9, %v1008_v47 }
 0x6c6   : > { %v1006_v48 = vpop.f32.mrf.mxu2 }
 0x734   : > { %v1101_v49 = vpop.f32.mrf.mxu2 }
 0x73c   : > { %v1103_v50 = vpop.f32.mrf.mxu2 }
 0x73e   : > { %v1025_v52 = vpop.f32.mrf.mxu0 }
 0x73f   : > { %v1029_v53 = vadd.f32 %v1025_v52, %v951_v51 }
 0x741   : > { %v1105_v55 = vadd.f32 %v1101_v49, %v1029_v53 }
 0x743   : > { %v2334_v56 = vadd.f32 %v1105_v55, %v746_v54 }
 0x745   : > { %v1109_v57 = vsel %vm768_vm10, %v2334_v56, 0.0 }
 0x746   : > { %v1027_v58 = vpop.f32.mrf.mxu0  ;;  %1110 = vadd.xlane.f32.xlu2 %v1109_v57 }
 0x7b9   : > { %v1111_v2 = vpop.xlane.xlu2 %1110 }
 0x7ba   : > { %v1119_v3 = vmul.f32 %v1118_v1, %v1111_v2 }
 0x7bc   : > { %v1120_v4 = vsub.f32 %v2334_v56, %v1119_v3 }
 0x7be   : > { %v1121_v5 = vmul.f32 %v1120_v4, %v1120_v4  ;;  %v1143_v25 = vmul.f32 %v1670_v24, %v1120_v4 }
 0x7c0   : > { %v1122_v6 = vsel %vm768_vm10, %v1121_v5, 0.0 }
 0x7c1   : > { %1123 = vadd.xlane.f32.xlu0 %v1122_v6 }
 0x834   : > { %v1124_v9 = vpop.xlane.xlu0 %1123 }
 0x835   : > { %v1125_v10 = vmul.f32 0.032258064, %v1124_v9 }
 0x837   : > { %1692 = vrsqrt.f32 %v1125_v10  ;;  %vm1133_vm14 = vcmp.eq.f32.partialorder %v1125_v10, inf  ;;  %v1136_v20 = vand.u32 2147483648, %v1125_v10  ;;  %vm1135_vm15 = vcmp.eq.f32.partialorder %v1125_v10, 0.0 }
 0x83d   : > { %v1693_v12 = vpop.eup %1692 }
 0x83e   : > { %v1127_v14 = vmul.f32 %v1693_v12, %v1125_v10 }
 0x840   : > { %v1128_v15 = vmul.f32 %v1693_v12, %v1127_v14 }
 0x842   : > { %v1129_v16 = vmul.f32 0.5, %v1128_v15 }
 0x844   : > { %v1130_v17 = vsub.f32 1.5, %v1129_v16 }
 0x846   : > { %v1131_v18 = vmul.f32 %v1693_v12, %v1130_v17 }
 0x848   : > { %v1132_v19 = vmul.f32 %v1131_v18, %v1125_v10 }
 0x84a   : > { %v1134_v21 = vsel %vm1133_vm14, %v1125_v10, %v1132_v19 }
 0x84b   : > { %v1137_v22 = vsel %vm1135_vm15, %v1136_v20, %v1134_v21 }
 0x84c   : > { %v1138_v23 = vadd.f32 1e-06, %v1137_v22 }
 0x84e   : > { %1694 = vrcp.f32 %v1138_v23 }
 0x854   : > { %v1695_v28 = vpop.eup %1694 }
 0x855   : > { %v1144_v29 = vmul.f32 %v1695_v28, %v1143_v25 }
 0x857   : > { %v1148_v26 = vadd.f32 %v1671_v27, %v1144_v29 }
 0x859   : > { %v1149_v30 = vpack.c.bf16 %v1148_v26, %v1148_v26 }
 0x85b   : > { %1468 = vmatmul.msk.bf16.vlgmr.msrb.gmra.mxu0 %vm768_vm10, %v1149_v30 }
 0x8d8   : > { %v1182_v34 = vpop.f32.mrf.mxu0 }
 0x8d9   : > { %v1183_v35 = vadd.f32 %v1672_v33, %v1182_v34 }
 0x8db   : > { %v1186_v36 = vmax.f32 %v1183_v35, 0.0 }
 0x8dd   : > { %v1187_v37 = vpack.c.bf16 %v1186_v36, %v1186_v36 }
 0x8df   : > { %1485 = vmatmul.msk.bf16.vlgmr.msrb.gmra.mxu1 %vm1224_vm0, %v1187_v37 }
 0x8e0   : > { %v1184_v38 = vpop.f32.mrf.mxu0 }
 0x95c   : > { %v1237_v40 = vpop.f32.mrf.mxu1 }
 0x95d   : > { %v1238_v41 = vadd.f32 %v1673_v39, %v1237_v40 }
 0x95f   : > { %v1241_v42 = vadd.f32 %v1238_v41, %v2334_v56 }
 0x961   : > { %1242 = vst.msk [vmem:[%s575_s24] sm:$0xff] %vm768_vm10, %v1241_v42 }
 0x962   : > { %1873 = shalt.err (!%p1870_p6)
}
 0x963   : > { %1524 = dma.vmem_to_hbm [thread:$0]  (%p2198_p8), %s1259_s0, 128, %s1261_s1, %s1244_s3  }
 0x964   : > { %v1239_v43 = vpop.f32.mrf.mxu1 }
 0x965 PF: > { %p1556_p7 = scmp.ge.s32.totalorder %s1976_s23, 2  ;;  %s1272_s8 = sand.u32 1, %s1936_s29  }
 0x966   : > { %s1273_s24 = scalar_lea.sflag [#allocation8], %s1272_s8 }
 0x967   : > { %p1544_p11 = pnand %p1556_p7, %p2208_p9 }
 0x969   : > { %p1545_p2 = pneg %p1544_p11 }
 0x96b   : > { %1931 = dma.done.wait (%p1545_p2), %s1273_s24, 128  }
 0x96c   : > { %1933 = vsyncadd (%p1545_p2), %s1273_s24, 4294967168  ;;  %s32_s23 = sadd.s32 1, %s1976_s23   ;;  %s2489_s0 = sld [smem:[#allocation21_spill]] }
 0x96d   : > { %p29_p4 = scmp.ge.s32.totalorder %s32_s23, 6   ;;  %s2490_s29 = smov %s1940_s30 }
 0x96e   : > { %s2491_s30 = smov %s1944_s15  ;;  %s2492_s15 = smov %s2206_s13 }
 0x96f   : > { %s2493_s16 = smov %s1952_s17  ;;  %s2494_s17 = smov %s1956_s18 }
 0x970   : > { %s2495_s18 = smov %s2203_s28  ;;  %s2496_s19 = smov %s1968_s21 }
 0x971   : > { %s2497_s20 = smov %s1972_s22  ;;  %s2498_s21 = smov %s2501_s5 }
 0x972   : > { %s2499_s22 = smov %s2489_s0  ;;  %31 = sbr.rel (!%p29_p4) target bundleno = 27 (0x1b), region = 146 }
 0x977   :  { %1279 = vsyncpa [#allocation7], 1 }
 0x978   :  { %1281 = vsyncpa [#allocation7 + $0x1], 1 }
 0x979   :  { %1282 = vsyncpa [#allocation10], 1 }
 0x97a   :  { %1283 = vsyncpa [#allocation13], 1 }
 0x97b   :  { %1284 = vsyncpa [#allocation8], 1 }
 0x97c   :  { %1286 = vsyncpa [#allocation8 + $0x1], 1 }

</bundles_post_ra>
